<compile_context>
chip_gen: v5e
topology: v5e:2x2
jax: 0.10.0
libtpu: 0.0.40
codegen_flags: <defaults>
</compile_context>

<pallas_src>
import math

import jax
import jax.numpy as jnp
from jax.experimental import pallas as pl
from jax.experimental.pallas import tpu as pltpu

# ---------------- scaled-down "vit-tiny" config ----------------
PATCH = 16
IMG = 32
CHANNELS = 3
HIDDEN = 128
HEADS = 2
LAYERS = 2
MLP = 256
LN_EPS = 1e-12

N_PATCH = (IMG // PATCH) ** 2          # 4 patches
SEQ = N_PATCH + 1                      # 5 tokens (CLS + patches)
PATCH_DIM = CHANNELS * PATCH * PATCH   # 768
HEAD_DIM = HIDDEN // HEADS             # 64

_WEIGHT_KEYS = (
    "patch_w", "patch_b", "cls", "pos",
    "ln1_g", "ln1_b", "wqkv", "bqkv", "wo", "bo",
    "ln2_g", "ln2_b", "w1", "b1", "w2", "b2",
)


# ---------------------------------------------------------------
# Single fused kernel: patch-embed -> CLS/pos -> encoder x LAYERS -> mean pool
# Grid = (B,), one image per grid step ("parallel" => megacore split on v7x).
# ---------------------------------------------------------------
def _vit_fused_kernel(
    patches_ref,          # (1, N_PATCH, PATCH_DIM)
    pw_ref, pb_ref,       # (PATCH_DIM, D), (1, D)
    cls_ref, pos_ref,     # (1, D), (SEQ, D)
    ln1g_ref, ln1b_ref,   # (LAYERS, 1, D)
    wqkv_ref, bqkv_ref,   # (LAYERS, D, 3D), (LAYERS, 1, 3D)
    wo_ref, bo_ref,       # (LAYERS, D, D),  (LAYERS, 1, D)
    ln2g_ref, ln2b_ref,   # (LAYERS, 1, D)
    w1_ref, b1_ref,       # (LAYERS, D, MLP), (LAYERS, 1, MLP)
    w2_ref, b2_ref,       # (LAYERS, MLP, D), (LAYERS, 1, D)
    o_ref,                # (1, 1, D)
):
    def layernorm(v, g, b):
        mu = jnp.mean(v, axis=-1, keepdims=True)
        var = jnp.mean(jnp.square(v - mu), axis=-1, keepdims=True)
        return (v - mu) * jax.lax.rsqrt(var + LN_EPS) * g + b

    # ---- patch embedding + CLS token + position embeddings (one image) ----
    pe = (jnp.dot(patches_ref[0], pw_ref[...],
                  preferred_element_type=jnp.float32) + pb_ref[...])   # (N_PATCH, D)
    cls_row = cls_ref[...] + pos_ref[0:1, :]                           # (1, D)
    patch_rows = pe + pos_ref[1:SEQ, :]                                # (N_PATCH, D)
    x = jnp.concatenate([cls_row, patch_rows], axis=0)                 # (SEQ, D)

    scale = 1.0 / math.sqrt(HEAD_DIM)
    inv_sqrt2 = 1.0 / math.sqrt(2.0)

    for l in range(LAYERS):  # static unroll (LAYERS is small)
        # --- MHSA block (layernorm_before), fused QKV projection ---
        xn = layernorm(x, ln1g_ref[l], ln1b_ref[l])
        qkv = (jnp.dot(xn, wqkv_ref[l], preferred_element_type=jnp.float32)
               + bqkv_ref[l])                                          # (SEQ, 3D)
        q = qkv[:, 0 * HIDDEN:1 * HIDDEN]   # 128-lane-aligned slices (free)
        k = qkv[:, 1 * HIDDEN:2 * HIDDEN]
        v = qkv[:, 2 * HIDDEN:3 * HIDDEN]

        wo_l = wo_ref[l]                                               # (D, D)
        # Accumulate the output projection per head instead of concatenating:
        #   concat_h(o_h) @ Wo  ==  sum_h o_h @ Wo[h*hd:(h+1)*hd, :]
        attn = jnp.zeros((SEQ, HIDDEN), jnp.float32)
        for h in range(HEADS):  # static unroll, HEADS is small
            sl = slice(h * HEAD_DIM, (h + 1) * HEAD_DIM)
            qh, kh, vh = q[:, sl], k[:, sl], v[:, sl]
            s = jnp.dot(qh, kh.T, preferred_element_type=jnp.float32) * scale
            s = s - jnp.max(s, axis=-1, keepdims=True)
            p = jnp.exp(s)
            p = p / jnp.sum(p, axis=-1, keepdims=True)
            oh = jnp.dot(p, vh, preferred_element_type=jnp.float32)    # (SEQ, hd)
            attn = attn + jnp.dot(oh, wo_l[sl, :],
                                  preferred_element_type=jnp.float32)
        attn = attn + bo_ref[l]
        x1 = x + attn  # residual

        # --- MLP block (layernorm_after), exact (erf) GELU like HF ViT ---
        x1n = layernorm(x1, ln2g_ref[l], ln2b_ref[l])
        hmid = (jnp.dot(x1n, w1_ref[l], preferred_element_type=jnp.float32)
                + b1_ref[l])
        hmid = 0.5 * hmid * (1.0 + jax.lax.erf(hmid * inv_sqrt2))
        x = x1 + jnp.dot(hmid, w2_ref[l],
                         preferred_element_type=jnp.float32) + b2_ref[l]  # residual

    # ---- hidden_states[-1].mean(dim=1)  (CLS included, no final LayerNorm) ----
    o_ref[0] = jnp.mean(x, axis=0, keepdims=True)                      # (1, D)


def _const_spec(w):
    nd = w.ndim
    return pl.BlockSpec(w.shape, lambda i, _n=nd: (0,) * _n)


# ---------------------------------------------------------------
# Glue (plain JAX): patch extraction (pure layout transform)
# ---------------------------------------------------------------
def extract_patches(x):
    # x: (B, C, H, W)  ->  (B, N_PATCH, C*P*P) with row-major (h, w) patch order
    B, C, H, W = x.shape
    gh, gw = H // PATCH, W // PATCH
    x = x.reshape(B, C, gh, PATCH, gw, PATCH)
    x = x.transpose(0, 2, 4, 1, 3, 5)          # (B, gh, gw, C, P, P)
    return x.reshape(B, gh * gw, C * PATCH * PATCH)


def vit_backbone_forward(x, params):
    B = x.shape[0]
    patches = extract_patches(x)                                       # (B, N, C*P*P)
    weights = [params[k] for k in _WEIGHT_KEYS]
    out = pl.pallas_call(
        _vit_fused_kernel,
        out_shape=jax.ShapeDtypeStruct((B, 1, HIDDEN), jnp.float32),
        grid=(B,),
        in_specs=[pl.BlockSpec((1, N_PATCH, PATCH_DIM), lambda i: (i, 0, 0))]
                 + [_const_spec(w) for w in weights],
        out_specs=pl.BlockSpec((1, 1, HIDDEN), lambda i: (i, 0, 0)),
        compiler_params=pltpu.CompilerParams(dimension_semantics=("parallel",)),
    )(patches, *weights)
    return out[:, 0, :]                                                # (B, D)


# ---------------------------------------------------------------
# Deterministic parameter init (synthetic, not pretrained)
# Per-layer weights are stacked along a leading LAYERS axis; q/k/v are fused.
# ---------------------------------------------------------------
def init_params(key):
    keys = iter(jax.random.split(key, 32))

    def nrm(shape, scale=0.02):
        return scale * jax.random.normal(next(keys), shape, jnp.float32)

    return {
        "patch_w": nrm((PATCH_DIM, HIDDEN)),     # conv weight, flattened (C,P,P) order
        "patch_b": jnp.zeros((1, HIDDEN), jnp.float32),
        "cls": nrm((1, HIDDEN)),
        "pos": nrm((SEQ, HIDDEN)),
        "ln1_g": jnp.ones((LAYERS, 1, HIDDEN), jnp.float32),
        "ln1_b": jnp.zeros((LAYERS, 1, HIDDEN), jnp.float32),
        "wqkv": nrm((LAYERS, HIDDEN, 3 * HIDDEN)),
        "bqkv": jnp.zeros((LAYERS, 1, 3 * HIDDEN), jnp.float32),
        "wo": nrm((LAYERS, HIDDEN, HIDDEN)),
        "bo": jnp.zeros((LAYERS, 1, HIDDEN), jnp.float32),
        "ln2_g": jnp.ones((LAYERS, 1, HIDDEN), jnp.float32),
        "ln2_b": jnp.zeros((LAYERS, 1, HIDDEN), jnp.float32),
        "w1": nrm((LAYERS, HIDDEN, MLP)),
        "b1": jnp.zeros((LAYERS, 1, MLP), jnp.float32),
        "w2": nrm((LAYERS, MLP, HIDDEN)),
        "b2": jnp.zeros((LAYERS, 1, HIDDEN), jnp.float32),
    }


if __name__ == "__main__":
    key = jax.random.PRNGKey(0)
    params = init_params(key)
    x = jax.random.normal(jax.random.fold_in(key, 123),
                          (2, CHANNELS, IMG, IMG), jnp.float32)

    out = jax.jit(vit_backbone_forward)(x, params)
    out = jax.block_until_ready(out)

    assert out.shape == (2, HIDDEN), out.shape
    assert jnp.all(jnp.isfinite(out))
    print("KERNEL_OK")
</pallas_src>

<mosaic_0001>
module attributes {stable_mosaic.version = 11 : i64} {
  func.func @_vit_fused_kernel(%arg0: i32, %arg1: memref<1x4x768xf32, #tpu.memory_space<vmem>>, %arg2: memref<768x128xf32, #tpu.memory_space<vmem>>, %arg3: memref<1x128xf32, #tpu.memory_space<vmem>>, %arg4: memref<1x128xf32, #tpu.memory_space<vmem>>, %arg5: memref<5x128xf32, #tpu.memory_space<vmem>>, %arg6: memref<2x1x128xf32, #tpu.memory_space<vmem>>, %arg7: memref<2x1x128xf32, #tpu.memory_space<vmem>>, %arg8: memref<2x128x384xf32, #tpu.memory_space<vmem>>, %arg9: memref<2x1x384xf32, #tpu.memory_space<vmem>>, %arg10: memref<2x128x128xf32, #tpu.memory_space<vmem>>, %arg11: memref<2x1x128xf32, #tpu.memory_space<vmem>>, %arg12: memref<2x1x128xf32, #tpu.memory_space<vmem>>, %arg13: memref<2x1x128xf32, #tpu.memory_space<vmem>>, %arg14: memref<2x128x256xf32, #tpu.memory_space<vmem>>, %arg15: memref<2x1x256xf32, #tpu.memory_space<vmem>>, %arg16: memref<2x256x128xf32, #tpu.memory_space<vmem>>, %arg17: memref<2x1x128xf32, #tpu.memory_space<vmem>>, %arg18: memref<1x1x128xf32, #tpu.memory_space<vmem>>) attributes {dimension_semantics = [#tpu.dimension_semantics<parallel>], iteration_bounds = array<i64: 2>, scalar_prefetch = 0 : i64, scratch_operands = 0 : i64, tpu.core_type = #tpu.core_type<tc>, window_params = [{transform_indices = @transform_0, window_bounds = array<i64: 1, 4, 768>}, {pipeline_mode = #tpu.pipeline_mode<synchronous>, transform_indices = @transform_1, window_bounds = array<i64: 768, 128>}, {pipeline_mode = #tpu.pipeline_mode<synchronous>, transform_indices = @transform_2, window_bounds = array<i64: 1, 128>}, {pipeline_mode = #tpu.pipeline_mode<synchronous>, transform_indices = @transform_3, window_bounds = array<i64: 1, 128>}, {pipeline_mode = #tpu.pipeline_mode<synchronous>, transform_indices = @transform_4, window_bounds = array<i64: 5, 128>}, {pipeline_mode = #tpu.pipeline_mode<synchronous>, transform_indices = @transform_5, window_bounds = array<i64: 2, 1, 128>}, {pipeline_mode = #tpu.pipeline_mode<synchronous>, transform_indices = @transform_6, window_bounds = array<i64: 2, 1, 128>}, {pipeline_mode = #tpu.pipeline_mode<synchronous>, transform_indices = @transform_7, window_bounds = array<i64: 2, 128, 384>}, {pipeline_mode = #tpu.pipeline_mode<synchronous>, transform_indices = @transform_8, window_bounds = array<i64: 2, 1, 384>}, {pipeline_mode = #tpu.pipeline_mode<synchronous>, transform_indices = @transform_9, window_bounds = array<i64: 2, 128, 128>}, {pipeline_mode = #tpu.pipeline_mode<synchronous>, transform_indices = @transform_10, window_bounds = array<i64: 2, 1, 128>}, {pipeline_mode = #tpu.pipeline_mode<synchronous>, transform_indices = @transform_11, window_bounds = array<i64: 2, 1, 128>}, {pipeline_mode = #tpu.pipeline_mode<synchronous>, transform_indices = @transform_12, window_bounds = array<i64: 2, 1, 128>}, {pipeline_mode = #tpu.pipeline_mode<synchronous>, transform_indices = @transform_13, window_bounds = array<i64: 2, 128, 256>}, {pipeline_mode = #tpu.pipeline_mode<synchronous>, transform_indices = @transform_14, window_bounds = array<i64: 2, 1, 256>}, {pipeline_mode = #tpu.pipeline_mode<synchronous>, transform_indices = @transform_15, window_bounds = array<i64: 2, 256, 128>}, {pipeline_mode = #tpu.pipeline_mode<synchronous>, transform_indices = @transform_16, window_bounds = array<i64: 2, 1, 128>}, {transform_indices = @transform_17, window_bounds = array<i64: 1, 1, 128>}]} {
    %c0 = arith.constant 0 : index
    %c0_0 = arith.constant 0 : index
    %c0_1 = arith.constant 0 : index
    %0 = vector.load %arg1[%c0, %c0_0, %c0_1] : memref<1x4x768xf32, #tpu.memory_space<vmem>>, vector<1x4x768xf32>
    %1 = vector.shape_cast %0 : vector<1x4x768xf32> to vector<4x768xf32>
    %c0_2 = arith.constant 0 : index
    %c0_3 = arith.constant 0 : index
    %2 = vector.load %arg2[%c0_2, %c0_3] : memref<768x128xf32, #tpu.memory_space<vmem>>, vector<768x128xf32>
    %cst = arith.constant dense<0.000000e+00> : vector<4x128xf32>
    %3 = tpu.matmul %1, %2, %cst {dimension_numbers = #tpu.dot_dimension_numbers<[1], [0], [0], [1], [0, 0, 1, 1], [], []>} : vector<4x768xf32>, vector<768x128xf32>, vector<4x128xf32> -> vector<4x128xf32>
    %c0_4 = arith.constant 0 : index
    %c0_5 = arith.constant 0 : index
    %4 = vector.load %arg3[%c0_4, %c0_5] : memref<1x128xf32, #tpu.memory_space<vmem>>, vector<1x128xf32>
    %5 = vector.broadcast %4 : vector<1x128xf32> to vector<4x128xf32>
    %6 = arith.addf %3, %5 : vector<4x128xf32>
    %c0_6 = arith.constant 0 : index
    %c0_7 = arith.constant 0 : index
    %7 = vector.load %arg4[%c0_6, %c0_7] : memref<1x128xf32, #tpu.memory_space<vmem>>, vector<1x128xf32>
    %c0_8 = arith.constant 0 : index
    %c0_9 = arith.constant 0 : index
    %8 = vector.load %arg5[%c0_8, %c0_9] : memref<5x128xf32, #tpu.memory_space<vmem>>, vector<1x128xf32>
    %9 = arith.addf %7, %8 : vector<1x128xf32>
    %c1 = arith.constant 1 : index
    %c0_10 = arith.constant 0 : index
    %10 = vector.load %arg5[%c1, %c0_10] : memref<5x128xf32, #tpu.memory_space<vmem>>, vector<4x128xf32>
    %11 = arith.addf %6, %10 : vector<4x128xf32>
    %12 = tpu.concatenate %9, %11 in 0 : vector<1x128xf32>, vector<4x128xf32> -> vector<5x128xf32>
    %c0_11 = arith.constant 0 : index
    %c0_12 = arith.constant 0 : index
    %c0_13 = arith.constant 0 : index
    %13 = vector.load %arg6[%c0_11, %c0_12, %c0_13] : memref<2x1x128xf32, #tpu.memory_space<vmem>>, vector<1x1x128xf32>
    %14 = vector.shape_cast %13 : vector<1x1x128xf32> to vector<1x128xf32>
    %c0_14 = arith.constant 0 : index
    %c0_15 = arith.constant 0 : index
    %c0_16 = arith.constant 0 : index
    %15 = vector.load %arg7[%c0_14, %c0_15, %c0_16] : memref<2x1x128xf32, #tpu.memory_space<vmem>>, vector<1x1x128xf32>
    %16 = vector.shape_cast %15 : vector<1x1x128xf32> to vector<1x128xf32>
    %cst_17 = arith.constant dense<0.000000e+00> : vector<5xf32>
    %17 = vector.multi_reduction <add>, %12, %cst_17 [1] : vector<5x128xf32> to vector<5xf32>
    %18 = vector.shape_cast %17 : vector<5xf32> to vector<5x1xf32>
    %cst_18 = arith.constant 1.280000e+02 : f32
    %19 = vector.broadcast %cst_18 : f32 to vector<5x1xf32>
    %20 = arith.divf %18, %19 : vector<5x1xf32>
    %21 = vector.broadcast %20 : vector<5x1xf32> to vector<5x128xf32>
    %22 = arith.subf %12, %21 : vector<5x128xf32>
    %23 = arith.mulf %22, %22 : vector<5x128xf32>
    %cst_19 = arith.constant dense<0.000000e+00> : vector<5xf32>
    %24 = vector.multi_reduction <add>, %23, %cst_19 [1] : vector<5x128xf32> to vector<5xf32>
    %25 = vector.shape_cast %24 : vector<5xf32> to vector<5x1xf32>
    %cst_20 = arith.constant 1.280000e+02 : f32
    %26 = vector.broadcast %cst_20 : f32 to vector<5x1xf32>
    %27 = arith.divf %25, %26 : vector<5x1xf32>
    %28 = vector.broadcast %20 : vector<5x1xf32> to vector<5x128xf32>
    %29 = arith.subf %12, %28 : vector<5x128xf32>
    %cst_21 = arith.constant 9.99999996E-13 : f32
    %30 = vector.broadcast %cst_21 : f32 to vector<5x1xf32>
    %31 = arith.addf %27, %30 : vector<5x1xf32>
    %32 = math.rsqrt %31 : vector<5x1xf32>
    %33 = vector.broadcast %32 : vector<5x1xf32> to vector<5x128xf32>
    %34 = arith.mulf %29, %33 : vector<5x128xf32>
    %35 = vector.broadcast %14 : vector<1x128xf32> to vector<5x128xf32>
    %36 = arith.mulf %34, %35 : vector<5x128xf32>
    %37 = vector.broadcast %16 : vector<1x128xf32> to vector<5x128xf32>
    %38 = arith.addf %36, %37 : vector<5x128xf32>
    %c0_22 = arith.constant 0 : index
    %c0_23 = arith.constant 0 : index
    %c0_24 = arith.constant 0 : index
    %39 = vector.load %arg8[%c0_22, %c0_23, %c0_24] : memref<2x128x384xf32, #tpu.memory_space<vmem>>, vector<1x128x384xf32>
    %40 = vector.shape_cast %39 : vector<1x128x384xf32> to vector<128x384xf32>
    %cst_25 = arith.constant dense<0.000000e+00> : vector<5x384xf32>
    %41 = tpu.matmul %38, %40, %cst_25 {dimension_numbers = #tpu.dot_dimension_numbers<[1], [0], [0], [1], [0, 0, 1, 1], [], []>} : vector<5x128xf32>, vector<128x384xf32>, vector<5x384xf32> -> vector<5x384xf32>
    %c0_26 = arith.constant 0 : index
    %c0_27 = arith.constant 0 : index
    %c0_28 = arith.constant 0 : index
    %42 = vector.load %arg9[%c0_26, %c0_27, %c0_28] : memref<2x1x384xf32, #tpu.memory_space<vmem>>, vector<1x1x384xf32>
    %43 = vector.shape_cast %42 : vector<1x1x384xf32> to vector<1x384xf32>
    %44 = vector.broadcast %43 : vector<1x384xf32> to vector<5x384xf32>
    %45 = arith.addf %41, %44 : vector<5x384xf32>
    %46 = vector.extract_strided_slice %45 {offsets = [0, 0], sizes = [5, 128], strides = [1, 1]} : vector<5x384xf32> to vector<5x128xf32>
    %47 = vector.extract_strided_slice %45 {offsets = [0, 128], sizes = [5, 128], strides = [1, 1]} : vector<5x384xf32> to vector<5x128xf32>
    %48 = vector.extract_strided_slice %45 {offsets = [0, 256], sizes = [5, 128], strides = [1, 1]} : vector<5x384xf32> to vector<5x128xf32>
    %c0_29 = arith.constant 0 : index
    %c0_30 = arith.constant 0 : index
    %c0_31 = arith.constant 0 : index
    %49 = vector.load %arg10[%c0_29, %c0_30, %c0_31] : memref<2x128x128xf32, #tpu.memory_space<vmem>>, vector<1x128x128xf32>
    %50 = vector.shape_cast %49 : vector<1x128x128xf32> to vector<128x128xf32>
    %cst_32 = arith.constant 0.000000e+00 : f32
    %51 = vector.broadcast %cst_32 : f32 to vector<5x128xf32>
    %52 = vector.extract_strided_slice %46 {offsets = [0, 0], sizes = [5, 64], strides = [1, 1]} : vector<5x128xf32> to vector<5x64xf32>
    %53 = vector.extract_strided_slice %47 {offsets = [0, 0], sizes = [5, 64], strides = [1, 1]} : vector<5x128xf32> to vector<5x64xf32>
    %54 = vector.extract_strided_slice %48 {offsets = [0, 0], sizes = [5, 64], strides = [1, 1]} : vector<5x128xf32> to vector<5x64xf32>
    %55 = tpu.transpose %53, [1, 0] : vector<5x64xf32> -> vector<64x5xf32>
    %cst_33 = arith.constant dense<0.000000e+00> : vector<5x5xf32>
    %56 = tpu.matmul %52, %55, %cst_33 {dimension_numbers = #tpu.dot_dimension_numbers<[1], [0], [0], [1], [0, 0, 1, 1], [], []>} : vector<5x64xf32>, vector<64x5xf32>, vector<5x5xf32> -> vector<5x5xf32>
    %cst_34 = arith.constant 1.250000e-01 : f32
    %57 = vector.broadcast %cst_34 : f32 to vector<5x5xf32>
    %58 = arith.mulf %56, %57 : vector<5x5xf32>
    %cst_35 = arith.constant dense<0xFF800000> : vector<5xf32>
    %59 = vector.multi_reduction <maximumf>, %58, %cst_35 [1] : vector<5x5xf32> to vector<5xf32>
    %60 = vector.shape_cast %59 : vector<5xf32> to vector<5x1xf32>
    %61 = vector.broadcast %60 : vector<5x1xf32> to vector<5x5xf32>
    %62 = arith.subf %58, %61 : vector<5x5xf32>
    %63 = math.exp %62 : vector<5x5xf32>
    %cst_36 = arith.constant dense<0.000000e+00> : vector<5xf32>
    %64 = vector.multi_reduction <add>, %63, %cst_36 [1] : vector<5x5xf32> to vector<5xf32>
    %65 = vector.shape_cast %64 : vector<5xf32> to vector<5x1xf32>
    %66 = vector.broadcast %65 : vector<5x1xf32> to vector<5x5xf32>
    %67 = arith.divf %63, %66 : vector<5x5xf32>
    %cst_37 = arith.constant dense<0.000000e+00> : vector<5x64xf32>
    %68 = tpu.matmul %67, %54, %cst_37 {dimension_numbers = #tpu.dot_dimension_numbers<[1], [0], [0], [1], [0, 0, 1, 1], [], []>} : vector<5x5xf32>, vector<5x64xf32>, vector<5x64xf32> -> vector<5x64xf32>
    %69 = vector.extract_strided_slice %50 {offsets = [0, 0], sizes = [64, 128], strides = [1, 1]} : vector<128x128xf32> to vector<64x128xf32>
    %cst_38 = arith.constant dense<0.000000e+00> : vector<5x128xf32>
    %70 = tpu.matmul %68, %69, %cst_38 {dimension_numbers = #tpu.dot_dimension_numbers<[1], [0], [0], [1], [0, 0, 1, 1], [], []>} : vector<5x64xf32>, vector<64x128xf32>, vector<5x128xf32> -> vector<5x128xf32>
    %71 = arith.addf %51, %70 : vector<5x128xf32>
    %72 = vector.extract_strided_slice %46 {offsets = [0, 64], sizes = [5, 64], strides = [1, 1]} : vector<5x128xf32> to vector<5x64xf32>
    %73 = vector.extract_strided_slice %47 {offsets = [0, 64], sizes = [5, 64], strides = [1, 1]} : vector<5x128xf32> to vector<5x64xf32>
    %74 = vector.extract_strided_slice %48 {offsets = [0, 64], sizes = [5, 64], strides = [1, 1]} : vector<5x128xf32> to vector<5x64xf32>
    %75 = tpu.transpose %73, [1, 0] : vector<5x64xf32> -> vector<64x5xf32>
    %cst_39 = arith.constant dense<0.000000e+00> : vector<5x5xf32>
    %76 = tpu.matmul %72, %75, %cst_39 {dimension_numbers = #tpu.dot_dimension_numbers<[1], [0], [0], [1], [0, 0, 1, 1], [], []>} : vector<5x64xf32>, vector<64x5xf32>, vector<5x5xf32> -> vector<5x5xf32>
    %cst_40 = arith.constant 1.250000e-01 : f32
    %77 = vector.broadcast %cst_40 : f32 to vector<5x5xf32>
    %78 = arith.mulf %76, %77 : vector<5x5xf32>
    %cst_41 = arith.constant dense<0xFF800000> : vector<5xf32>
    %79 = vector.multi_reduction <maximumf>, %78, %cst_41 [1] : vector<5x5xf32> to vector<5xf32>
    %80 = vector.shape_cast %79 : vector<5xf32> to vector<5x1xf32>
    %81 = vector.broadcast %80 : vector<5x1xf32> to vector<5x5xf32>
    %82 = arith.subf %78, %81 : vector<5x5xf32>
    %83 = math.exp %82 : vector<5x5xf32>
    %cst_42 = arith.constant dense<0.000000e+00> : vector<5xf32>
    %84 = vector.multi_reduction <add>, %83, %cst_42 [1] : vector<5x5xf32> to vector<5xf32>
    %85 = vector.shape_cast %84 : vector<5xf32> to vector<5x1xf32>
    %86 = vector.broadcast %85 : vector<5x1xf32> to vector<5x5xf32>
    %87 = arith.divf %83, %86 : vector<5x5xf32>
    %cst_43 = arith.constant dense<0.000000e+00> : vector<5x64xf32>
    %88 = tpu.matmul %87, %74, %cst_43 {dimension_numbers = #tpu.dot_dimension_numbers<[1], [0], [0], [1], [0, 0, 1, 1], [], []>} : vector<5x5xf32>, vector<5x64xf32>, vector<5x64xf32> -> vector<5x64xf32>
    %89 = vector.extract_strided_slice %50 {offsets = [64, 0], sizes = [64, 128], strides = [1, 1]} : vector<128x128xf32> to vector<64x128xf32>
    %cst_44 = arith.constant dense<0.000000e+00> : vector<5x128xf32>
    %90 = tpu.matmul %88, %89, %cst_44 {dimension_numbers = #tpu.dot_dimension_numbers<[1], [0], [0], [1], [0, 0, 1, 1], [], []>} : vector<5x64xf32>, vector<64x128xf32>, vector<5x128xf32> -> vector<5x128xf32>
    %91 = arith.addf %71, %90 : vector<5x128xf32>
    %c0_45 = arith.constant 0 : index
    %c0_46 = arith.constant 0 : index
    %c0_47 = arith.constant 0 : index
    %92 = vector.load %arg11[%c0_45, %c0_46, %c0_47] : memref<2x1x128xf32, #tpu.memory_space<vmem>>, vector<1x1x128xf32>
    %93 = vector.shape_cast %92 : vector<1x1x128xf32> to vector<1x128xf32>
    %94 = vector.broadcast %93 : vector<1x128xf32> to vector<5x128xf32>
    %95 = arith.addf %91, %94 : vector<5x128xf32>
    %96 = arith.addf %12, %95 : vector<5x128xf32>
    %c0_48 = arith.constant 0 : index
    %c0_49 = arith.constant 0 : index
    %c0_50 = arith.constant 0 : index
    %97 = vector.load %arg12[%c0_48, %c0_49, %c0_50] : memref<2x1x128xf32, #tpu.memory_space<vmem>>, vector<1x1x128xf32>
    %98 = vector.shape_cast %97 : vector<1x1x128xf32> to vector<1x128xf32>
    %c0_51 = arith.constant 0 : index
    %c0_52 = arith.constant 0 : index
    %c0_53 = arith.constant 0 : index
    %99 = vector.load %arg13[%c0_51, %c0_52, %c0_53] : memref<2x1x128xf32, #tpu.memory_space<vmem>>, vector<1x1x128xf32>
    %100 = vector.shape_cast %99 : vector<1x1x128xf32> to vector<1x128xf32>
    %cst_54 = arith.constant dense<0.000000e+00> : vector<5xf32>
    %101 = vector.multi_reduction <add>, %96, %cst_54 [1] : vector<5x128xf32> to vector<5xf32>
    %102 = vector.shape_cast %101 : vector<5xf32> to vector<5x1xf32>
    %cst_55 = arith.constant 1.280000e+02 : f32
    %103 = vector.broadcast %cst_55 : f32 to vector<5x1xf32>
    %104 = arith.divf %102, %103 : vector<5x1xf32>
    %105 = vector.broadcast %104 : vector<5x1xf32> to vector<5x128xf32>
    %106 = arith.subf %96, %105 : vector<5x128xf32>
    %107 = arith.mulf %106, %106 : vector<5x128xf32>
    %cst_56 = arith.constant dense<0.000000e+00> : vector<5xf32>
    %108 = vector.multi_reduction <add>, %107, %cst_56 [1] : vector<5x128xf32> to vector<5xf32>
    %109 = vector.shape_cast %108 : vector<5xf32> to vector<5x1xf32>
    %cst_57 = arith.constant 1.280000e+02 : f32
    %110 = vector.broadcast %cst_57 : f32 to vector<5x1xf32>
    %111 = arith.divf %109, %110 : vector<5x1xf32>
    %112 = vector.broadcast %104 : vector<5x1xf32> to vector<5x128xf32>
    %113 = arith.subf %96, %112 : vector<5x128xf32>
    %cst_58 = arith.constant 9.99999996E-13 : f32
    %114 = vector.broadcast %cst_58 : f32 to vector<5x1xf32>
    %115 = arith.addf %111, %114 : vector<5x1xf32>
    %116 = math.rsqrt %115 : vector<5x1xf32>
    %117 = vector.broadcast %116 : vector<5x1xf32> to vector<5x128xf32>
    %118 = arith.mulf %113, %117 : vector<5x128xf32>
    %119 = vector.broadcast %98 : vector<1x128xf32> to vector<5x128xf32>
    %120 = arith.mulf %118, %119 : vector<5x128xf32>
    %121 = vector.broadcast %100 : vector<1x128xf32> to vector<5x128xf32>
    %122 = arith.addf %120, %121 : vector<5x128xf32>
    %c0_59 = arith.constant 0 : index
    %c0_60 = arith.constant 0 : index
    %c0_61 = arith.constant 0 : index
    %123 = vector.load %arg14[%c0_59, %c0_60, %c0_61] : memref<2x128x256xf32, #tpu.memory_space<vmem>>, vector<1x128x256xf32>
    %124 = vector.shape_cast %123 : vector<1x128x256xf32> to vector<128x256xf32>
    %cst_62 = arith.constant dense<0.000000e+00> : vector<5x256xf32>
    %125 = tpu.matmul %122, %124, %cst_62 {dimension_numbers = #tpu.dot_dimension_numbers<[1], [0], [0], [1], [0, 0, 1, 1], [], []>} : vector<5x128xf32>, vector<128x256xf32>, vector<5x256xf32> -> vector<5x256xf32>
    %c0_63 = arith.constant 0 : index
    %c0_64 = arith.constant 0 : index
    %c0_65 = arith.constant 0 : index
    %126 = vector.load %arg15[%c0_63, %c0_64, %c0_65] : memref<2x1x256xf32, #tpu.memory_space<vmem>>, vector<1x1x256xf32>
    %127 = vector.shape_cast %126 : vector<1x1x256xf32> to vector<1x256xf32>
    %128 = vector.broadcast %127 : vector<1x256xf32> to vector<5x256xf32>
    %129 = arith.addf %125, %128 : vector<5x256xf32>
    %cst_66 = arith.constant 5.000000e-01 : f32
    %130 = vector.broadcast %cst_66 : f32 to vector<5x256xf32>
    %131 = arith.mulf %130, %129 : vector<5x256xf32>
    %cst_67 = arith.constant 0.707106769 : f32
    %132 = vector.broadcast %cst_67 : f32 to vector<5x256xf32>
    %133 = arith.mulf %129, %132 : vector<5x256xf32>
    %134 = math.erf %133 : vector<5x256xf32>
    %cst_68 = arith.constant 1.000000e+00 : f32
    %135 = vector.broadcast %cst_68 : f32 to vector<5x256xf32>
    %136 = arith.addf %135, %134 : vector<5x256xf32>
    %137 = arith.mulf %131, %136 : vector<5x256xf32>
    %c0_69 = arith.constant 0 : index
    %c0_70 = arith.constant 0 : index
    %c0_71 = arith.constant 0 : index
    %138 = vector.load %arg16[%c0_69, %c0_70, %c0_71] : memref<2x256x128xf32, #tpu.memory_space<vmem>>, vector<1x256x128xf32>
    %139 = vector.shape_cast %138 : vector<1x256x128xf32> to vector<256x128xf32>
    %cst_72 = arith.constant dense<0.000000e+00> : vector<5x128xf32>
    %140 = tpu.matmul %137, %139, %cst_72 {dimension_numbers = #tpu.dot_dimension_numbers<[1], [0], [0], [1], [0, 0, 1, 1], [], []>} : vector<5x256xf32>, vector<256x128xf32>, vector<5x128xf32> -> vector<5x128xf32>
    %141 = arith.addf %96, %140 : vector<5x128xf32>
    %c0_73 = arith.constant 0 : index
    %c0_74 = arith.constant 0 : index
    %c0_75 = arith.constant 0 : index
    %142 = vector.load %arg17[%c0_73, %c0_74, %c0_75] : memref<2x1x128xf32, #tpu.memory_space<vmem>>, vector<1x1x128xf32>
    %143 = vector.shape_cast %142 : vector<1x1x128xf32> to vector<1x128xf32>
    %144 = vector.broadcast %143 : vector<1x128xf32> to vector<5x128xf32>
    %145 = arith.addf %141, %144 : vector<5x128xf32>
    %c1_76 = arith.constant 1 : index
    %c0_77 = arith.constant 0 : index
    %c0_78 = arith.constant 0 : index
    %146 = vector.load %arg6[%c1_76, %c0_77, %c0_78] : memref<2x1x128xf32, #tpu.memory_space<vmem>>, vector<1x1x128xf32>
    %147 = vector.shape_cast %146 : vector<1x1x128xf32> to vector<1x128xf32>
    %c1_79 = arith.constant 1 : index
    %c0_80 = arith.constant 0 : index
    %c0_81 = arith.constant 0 : index
    %148 = vector.load %arg7[%c1_79, %c0_80, %c0_81] : memref<2x1x128xf32, #tpu.memory_space<vmem>>, vector<1x1x128xf32>
    %149 = vector.shape_cast %148 : vector<1x1x128xf32> to vector<1x128xf32>
    %cst_82 = arith.constant dense<0.000000e+00> : vector<5xf32>
    %150 = vector.multi_reduction <add>, %145, %cst_82 [1] : vector<5x128xf32> to vector<5xf32>
    %151 = vector.shape_cast %150 : vector<5xf32> to vector<5x1xf32>
    %cst_83 = arith.constant 1.280000e+02 : f32
    %152 = vector.broadcast %cst_83 : f32 to vector<5x1xf32>
    %153 = arith.divf %151, %152 : vector<5x1xf32>
    %154 = vector.broadcast %153 : vector<5x1xf32> to vector<5x128xf32>
    %155 = arith.subf %145, %154 : vector<5x128xf32>
    %156 = arith.mulf %155, %155 : vector<5x128xf32>
    %cst_84 = arith.constant dense<0.000000e+00> : vector<5xf32>
    %157 = vector.multi_reduction <add>, %156, %cst_84 [1] : vector<5x128xf32> to vector<5xf32>
    %158 = vector.shape_cast %157 : vector<5xf32> to vector<5x1xf32>
    %cst_85 = arith.constant 1.280000e+02 : f32
    %159 = vector.broadcast %cst_85 : f32 to vector<5x1xf32>
    %160 = arith.divf %158, %159 : vector<5x1xf32>
    %161 = vector.broadcast %153 : vector<5x1xf32> to vector<5x128xf32>
    %162 = arith.subf %145, %161 : vector<5x128xf32>
    %cst_86 = arith.constant 9.99999996E-13 : f32
    %163 = vector.broadcast %cst_86 : f32 to vector<5x1xf32>
    %164 = arith.addf %160, %163 : vector<5x1xf32>
    %165 = math.rsqrt %164 : vector<5x1xf32>
    %166 = vector.broadcast %165 : vector<5x1xf32> to vector<5x128xf32>
    %167 = arith.mulf %162, %166 : vector<5x128xf32>
    %168 = vector.broadcast %147 : vector<1x128xf32> to vector<5x128xf32>
    %169 = arith.mulf %167, %168 : vector<5x128xf32>
    %170 = vector.broadcast %149 : vector<1x128xf32> to vector<5x128xf32>
    %171 = arith.addf %169, %170 : vector<5x128xf32>
    %c1_87 = arith.constant 1 : index
    %c0_88 = arith.constant 0 : index
    %c0_89 = arith.constant 0 : index
    %172 = vector.load %arg8[%c1_87, %c0_88, %c0_89] : memref<2x128x384xf32, #tpu.memory_space<vmem>>, vector<1x128x384xf32>
    %173 = vector.shape_cast %172 : vector<1x128x384xf32> to vector<128x384xf32>
    %cst_90 = arith.constant dense<0.000000e+00> : vector<5x384xf32>
    %174 = tpu.matmul %171, %173, %cst_90 {dimension_numbers = #tpu.dot_dimension_numbers<[1], [0], [0], [1], [0, 0, 1, 1], [], []>} : vector<5x128xf32>, vector<128x384xf32>, vector<5x384xf32> -> vector<5x384xf32>
    %c1_91 = arith.constant 1 : index
    %c0_92 = arith.constant 0 : index
    %c0_93 = arith.constant 0 : index
    %175 = vector.load %arg9[%c1_91, %c0_92, %c0_93] : memref<2x1x384xf32, #tpu.memory_space<vmem>>, vector<1x1x384xf32>
    %176 = vector.shape_cast %175 : vector<1x1x384xf32> to vector<1x384xf32>
    %177 = vector.broadcast %176 : vector<1x384xf32> to vector<5x384xf32>
    %178 = arith.addf %174, %177 : vector<5x384xf32>
    %179 = vector.extract_strided_slice %178 {offsets = [0, 0], sizes = [5, 128], strides = [1, 1]} : vector<5x384xf32> to vector<5x128xf32>
    %180 = vector.extract_strided_slice %178 {offsets = [0, 128], sizes = [5, 128], strides = [1, 1]} : vector<5x384xf32> to vector<5x128xf32>
    %181 = vector.extract_strided_slice %178 {offsets = [0, 256], sizes = [5, 128], strides = [1, 1]} : vector<5x384xf32> to vector<5x128xf32>
    %c1_94 = arith.constant 1 : index
    %c0_95 = arith.constant 0 : index
    %c0_96 = arith.constant 0 : index
    %182 = vector.load %arg10[%c1_94, %c0_95, %c0_96] : memref<2x128x128xf32, #tpu.memory_space<vmem>>, vector<1x128x128xf32>
    %183 = vector.shape_cast %182 : vector<1x128x128xf32> to vector<128x128xf32>
    %cst_97 = arith.constant 0.000000e+00 : f32
    %184 = vector.broadcast %cst_97 : f32 to vector<5x128xf32>
    %185 = vector.extract_strided_slice %179 {offsets = [0, 0], sizes = [5, 64], strides = [1, 1]} : vector<5x128xf32> to vector<5x64xf32>
    %186 = vector.extract_strided_slice %180 {offsets = [0, 0], sizes = [5, 64], strides = [1, 1]} : vector<5x128xf32> to vector<5x64xf32>
    %187 = vector.extract_strided_slice %181 {offsets = [0, 0], sizes = [5, 64], strides = [1, 1]} : vector<5x128xf32> to vector<5x64xf32>
    %188 = tpu.transpose %186, [1, 0] : vector<5x64xf32> -> vector<64x5xf32>
    %cst_98 = arith.constant dense<0.000000e+00> : vector<5x5xf32>
    %189 = tpu.matmul %185, %188, %cst_98 {dimension_numbers = #tpu.dot_dimension_numbers<[1], [0], [0], [1], [0, 0, 1, 1], [], []>} : vector<5x64xf32>, vector<64x5xf32>, vector<5x5xf32> -> vector<5x5xf32>
    %cst_99 = arith.constant 1.250000e-01 : f32
    %190 = vector.broadcast %cst_99 : f32 to vector<5x5xf32>
    %191 = arith.mulf %189, %190 : vector<5x5xf32>
    %cst_100 = arith.constant dense<0xFF800000> : vector<5xf32>
    %192 = vector.multi_reduction <maximumf>, %191, %cst_100 [1] : vector<5x5xf32> to vector<5xf32>
    %193 = vector.shape_cast %192 : vector<5xf32> to vector<5x1xf32>
    %194 = vector.broadcast %193 : vector<5x1xf32> to vector<5x5xf32>
    %195 = arith.subf %191, %194 : vector<5x5xf32>
    %196 = math.exp %195 : vector<5x5xf32>
    %cst_101 = arith.constant dense<0.000000e+00> : vector<5xf32>
    %197 = vector.multi_reduction <add>, %196, %cst_101 [1] : vector<5x5xf32> to vector<5xf32>
    %198 = vector.shape_cast %197 : vector<5xf32> to vector<5x1xf32>
    %199 = vector.broadcast %198 : vector<5x1xf32> to vector<5x5xf32>
    %200 = arith.divf %196, %199 : vector<5x5xf32>
    %cst_102 = arith.constant dense<0.000000e+00> : vector<5x64xf32>
    %201 = tpu.matmul %200, %187, %cst_102 {dimension_numbers = #tpu.dot_dimension_numbers<[1], [0], [0], [1], [0, 0, 1, 1], [], []>} : vector<5x5xf32>, vector<5x64xf32>, vector<5x64xf32> -> vector<5x64xf32>
    %202 = vector.extract_strided_slice %183 {offsets = [0, 0], sizes = [64, 128], strides = [1, 1]} : vector<128x128xf32> to vector<64x128xf32>
    %cst_103 = arith.constant dense<0.000000e+00> : vector<5x128xf32>
    %203 = tpu.matmul %201, %202, %cst_103 {dimension_numbers = #tpu.dot_dimension_numbers<[1], [0], [0], [1], [0, 0, 1, 1], [], []>} : vector<5x64xf32>, vector<64x128xf32>, vector<5x128xf32> -> vector<5x128xf32>
    %204 = arith.addf %184, %203 : vector<5x128xf32>
    %205 = vector.extract_strided_slice %179 {offsets = [0, 64], sizes = [5, 64], strides = [1, 1]} : vector<5x128xf32> to vector<5x64xf32>
    %206 = vector.extract_strided_slice %180 {offsets = [0, 64], sizes = [5, 64], strides = [1, 1]} : vector<5x128xf32> to vector<5x64xf32>
    %207 = vector.extract_strided_slice %181 {offsets = [0, 64], sizes = [5, 64], strides = [1, 1]} : vector<5x128xf32> to vector<5x64xf32>
    %208 = tpu.transpose %206, [1, 0] : vector<5x64xf32> -> vector<64x5xf32>
    %cst_104 = arith.constant dense<0.000000e+00> : vector<5x5xf32>
    %209 = tpu.matmul %205, %208, %cst_104 {dimension_numbers = #tpu.dot_dimension_numbers<[1], [0], [0], [1], [0, 0, 1, 1], [], []>} : vector<5x64xf32>, vector<64x5xf32>, vector<5x5xf32> -> vector<5x5xf32>
    %cst_105 = arith.constant 1.250000e-01 : f32
    %210 = vector.broadcast %cst_105 : f32 to vector<5x5xf32>
    %211 = arith.mulf %209, %210 : vector<5x5xf32>
    %cst_106 = arith.constant dense<0xFF800000> : vector<5xf32>
    %212 = vector.multi_reduction <maximumf>, %211, %cst_106 [1] : vector<5x5xf32> to vector<5xf32>
    %213 = vector.shape_cast %212 : vector<5xf32> to vector<5x1xf32>
    %214 = vector.broadcast %213 : vector<5x1xf32> to vector<5x5xf32>
    %215 = arith.subf %211, %214 : vector<5x5xf32>
    %216 = math.exp %215 : vector<5x5xf32>
    %cst_107 = arith.constant dense<0.000000e+00> : vector<5xf32>
    %217 = vector.multi_reduction <add>, %216, %cst_107 [1] : vector<5x5xf32> to vector<5xf32>
    %218 = vector.shape_cast %217 : vector<5xf32> to vector<5x1xf32>
    %219 = vector.broadcast %218 : vector<5x1xf32> to vector<5x5xf32>
    %220 = arith.divf %216, %219 : vector<5x5xf32>
    %cst_108 = arith.constant dense<0.000000e+00> : vector<5x64xf32>
    %221 = tpu.matmul %220, %207, %cst_108 {dimension_numbers = #tpu.dot_dimension_numbers<[1], [0], [0], [1], [0, 0, 1, 1], [], []>} : vector<5x5xf32>, vector<5x64xf32>, vector<5x64xf32> -> vector<5x64xf32>
    %222 = vector.extract_strided_slice %183 {offsets = [64, 0], sizes = [64, 128], strides = [1, 1]} : vector<128x128xf32> to vector<64x128xf32>
    %cst_109 = arith.constant dense<0.000000e+00> : vector<5x128xf32>
    %223 = tpu.matmul %221, %222, %cst_109 {dimension_numbers = #tpu.dot_dimension_numbers<[1], [0], [0], [1], [0, 0, 1, 1], [], []>} : vector<5x64xf32>, vector<64x128xf32>, vector<5x128xf32> -> vector<5x128xf32>
    %224 = arith.addf %204, %223 : vector<5x128xf32>
    %c1_110 = arith.constant 1 : index
    %c0_111 = arith.constant 0 : index
    %c0_112 = arith.constant 0 : index
    %225 = vector.load %arg11[%c1_110, %c0_111, %c0_112] : memref<2x1x128xf32, #tpu.memory_space<vmem>>, vector<1x1x128xf32>
    %226 = vector.shape_cast %225 : vector<1x1x128xf32> to vector<1x128xf32>
    %227 = vector.broadcast %226 : vector<1x128xf32> to vector<5x128xf32>
    %228 = arith.addf %224, %227 : vector<5x128xf32>
    %229 = arith.addf %145, %228 : vector<5x128xf32>
    %c1_113 = arith.constant 1 : index
    %c0_114 = arith.constant 0 : index
    %c0_115 = arith.constant 0 : index
    %230 = vector.load %arg12[%c1_113, %c0_114, %c0_115] : memref<2x1x128xf32, #tpu.memory_space<vmem>>, vector<1x1x128xf32>
    %231 = vector.shape_cast %230 : vector<1x1x128xf32> to vector<1x128xf32>
    %c1_116 = arith.constant 1 : index
    %c0_117 = arith.constant 0 : index
    %c0_118 = arith.constant 0 : index
    %232 = vector.load %arg13[%c1_116, %c0_117, %c0_118] : memref<2x1x128xf32, #tpu.memory_space<vmem>>, vector<1x1x128xf32>
    %233 = vector.shape_cast %232 : vector<1x1x128xf32> to vector<1x128xf32>
    %cst_119 = arith.constant dense<0.000000e+00> : vector<5xf32>
    %234 = vector.multi_reduction <add>, %229, %cst_119 [1] : vector<5x128xf32> to vector<5xf32>
    %235 = vector.shape_cast %234 : vector<5xf32> to vector<5x1xf32>
    %cst_120 = arith.constant 1.280000e+02 : f32
    %236 = vector.broadcast %cst_120 : f32 to vector<5x1xf32>
    %237 = arith.divf %235, %236 : vector<5x1xf32>
    %238 = vector.broadcast %237 : vector<5x1xf32> to vector<5x128xf32>
    %239 = arith.subf %229, %238 : vector<5x128xf32>
    %240 = arith.mulf %239, %239 : vector<5x128xf32>
    %cst_121 = arith.constant dense<0.000000e+00> : vector<5xf32>
    %241 = vector.multi_reduction <add>, %240, %cst_121 [1] : vector<5x128xf32> to vector<5xf32>
    %242 = vector.shape_cast %241 : vector<5xf32> to vector<5x1xf32>
    %cst_122 = arith.constant 1.280000e+02 : f32
    %243 = vector.broadcast %cst_122 : f32 to vector<5x1xf32>
    %244 = arith.divf %242, %243 : vector<5x1xf32>
    %245 = vector.broadcast %237 : vector<5x1xf32> to vector<5x128xf32>
    %246 = arith.subf %229, %245 : vector<5x128xf32>
    %cst_123 = arith.constant 9.99999996E-13 : f32
    %247 = vector.broadcast %cst_123 : f32 to vector<5x1xf32>
    %248 = arith.addf %244, %247 : vector<5x1xf32>
    %249 = math.rsqrt %248 : vector<5x1xf32>
    %250 = vector.broadcast %249 : vector<5x1xf32> to vector<5x128xf32>
    %251 = arith.mulf %246, %250 : vector<5x128xf32>
    %252 = vector.broadcast %231 : vector<1x128xf32> to vector<5x128xf32>
    %253 = arith.mulf %251, %252 : vector<5x128xf32>
    %254 = vector.broadcast %233 : vector<1x128xf32> to vector<5x128xf32>
    %255 = arith.addf %253, %254 : vector<5x128xf32>
    %c1_124 = arith.constant 1 : index
    %c0_125 = arith.constant 0 : index
    %c0_126 = arith.constant 0 : index
    %256 = vector.load %arg14[%c1_124, %c0_125, %c0_126] : memref<2x128x256xf32, #tpu.memory_space<vmem>>, vector<1x128x256xf32>
    %257 = vector.shape_cast %256 : vector<1x128x256xf32> to vector<128x256xf32>
    %cst_127 = arith.constant dense<0.000000e+00> : vector<5x256xf32>
    %258 = tpu.matmul %255, %257, %cst_127 {dimension_numbers = #tpu.dot_dimension_numbers<[1], [0], [0], [1], [0, 0, 1, 1], [], []>} : vector<5x128xf32>, vector<128x256xf32>, vector<5x256xf32> -> vector<5x256xf32>
    %c1_128 = arith.constant 1 : index
    %c0_129 = arith.constant 0 : index
    %c0_130 = arith.constant 0 : index
    %259 = vector.load %arg15[%c1_128, %c0_129, %c0_130] : memref<2x1x256xf32, #tpu.memory_space<vmem>>, vector<1x1x256xf32>
    %260 = vector.shape_cast %259 : vector<1x1x256xf32> to vector<1x256xf32>
    %261 = vector.broadcast %260 : vector<1x256xf32> to vector<5x256xf32>
    %262 = arith.addf %258, %261 : vector<5x256xf32>
    %cst_131 = arith.constant 5.000000e-01 : f32
    %263 = vector.broadcast %cst_131 : f32 to vector<5x256xf32>
    %264 = arith.mulf %263, %262 : vector<5x256xf32>
    %cst_132 = arith.constant 0.707106769 : f32
    %265 = vector.broadcast %cst_132 : f32 to vector<5x256xf32>
    %266 = arith.mulf %262, %265 : vector<5x256xf32>
    %267 = math.erf %266 : vector<5x256xf32>
    %cst_133 = arith.constant 1.000000e+00 : f32
    %268 = vector.broadcast %cst_133 : f32 to vector<5x256xf32>
    %269 = arith.addf %268, %267 : vector<5x256xf32>
    %270 = arith.mulf %264, %269 : vector<5x256xf32>
    %c1_134 = arith.constant 1 : index
    %c0_135 = arith.constant 0 : index
    %c0_136 = arith.constant 0 : index
    %271 = vector.load %arg16[%c1_134, %c0_135, %c0_136] : memref<2x256x128xf32, #tpu.memory_space<vmem>>, vector<1x256x128xf32>
    %272 = vector.shape_cast %271 : vector<1x256x128xf32> to vector<256x128xf32>
    %cst_137 = arith.constant dense<0.000000e+00> : vector<5x128xf32>
    %273 = tpu.matmul %270, %272, %cst_137 {dimension_numbers = #tpu.dot_dimension_numbers<[1], [0], [0], [1], [0, 0, 1, 1], [], []>} : vector<5x256xf32>, vector<256x128xf32>, vector<5x128xf32> -> vector<5x128xf32>
    %274 = arith.addf %229, %273 : vector<5x128xf32>
    %c1_138 = arith.constant 1 : index
    %c0_139 = arith.constant 0 : index
    %c0_140 = arith.constant 0 : index
    %275 = vector.load %arg17[%c1_138, %c0_139, %c0_140] : memref<2x1x128xf32, #tpu.memory_space<vmem>>, vector<1x1x128xf32>
    %276 = vector.shape_cast %275 : vector<1x1x128xf32> to vector<1x128xf32>
    %277 = vector.broadcast %276 : vector<1x128xf32> to vector<5x128xf32>
    %278 = arith.addf %274, %277 : vector<5x128xf32>
    %cst_141 = arith.constant dense<0.000000e+00> : vector<128xf32>
    %279 = vector.multi_reduction <add>, %278, %cst_141 [0] : vector<5x128xf32> to vector<128xf32>
    %280 = vector.shape_cast %279 : vector<128xf32> to vector<1x128xf32>
    %cst_142 = arith.constant 5.000000e+00 : f32
    %281 = vector.broadcast %cst_142 : f32 to vector<1x128xf32>
    %282 = arith.divf %280, %281 : vector<1x128xf32>
    %c0_143 = arith.constant 0 : index
    %c0_144 = arith.constant 0 : index
    %c0_145 = arith.constant 0 : index
    %283 = vector.load %arg18[%c0_143, %c0_144, %c0_145] : memref<1x1x128xf32, #tpu.memory_space<vmem>>, vector<1x1x128xf32>
    %284 = vector.shape_cast %283 : vector<1x1x128xf32> to vector<1x128xf32>
    %285 = vector.shape_cast %282 : vector<1x128xf32> to vector<1x1x128xf32>
    tpu.vector_store %arg18[%c0_143, %c0_144, %c0_145], %285 {strides = array<i32>} : memref<1x1x128xf32, #tpu.memory_space<vmem>>, vector<1x1x128xf32>,
    return
  }
  func.func @transform_0(%arg0: i32) -> (i32, i32, i32) {
    %c0_i32 = arith.constant 0 : i32
    %c0_i32_0 = arith.constant 0 : i32
    %c0_i32_1 = arith.constant 0 : i32
    return %arg0, %c0_i32, %c0_i32_0 : i32, i32, i32
  }
  func.func @transform_1(%arg0: i32) -> (i32, i32) {
    %c0_i32 = arith.constant 0 : i32
    %c0_i32_0 = arith.constant 0 : i32
    %c0_i32_1 = arith.constant 0 : i32
    return %c0_i32, %c0_i32_0 : i32, i32
  }
  func.func @transform_2(%arg0: i32) -> (i32, i32) {
    %c0_i32 = arith.constant 0 : i32
    %c0_i32_0 = arith.constant 0 : i32
    %c0_i32_1 = arith.constant 0 : i32
    return %c0_i32, %c0_i32_0 : i32, i32
  }
  func.func @transform_3(%arg0: i32) -> (i32, i32) {
    %c0_i32 = arith.constant 0 : i32
    %c0_i32_0 = arith.constant 0 : i32
    %c0_i32_1 = arith.constant 0 : i32
    return %c0_i32, %c0_i32_0 : i32, i32
  }
  func.func @transform_4(%arg0: i32) -> (i32, i32) {
    %c0_i32 = arith.constant 0 : i32
    %c0_i32_0 = arith.constant 0 : i32
    %c0_i32_1 = arith.constant 0 : i32
    return %c0_i32, %c0_i32_0 : i32, i32
  }
  func.func @transform_5(%arg0: i32) -> (i32, i32, i32) {
    %c0_i32 = arith.constant 0 : i32
    %c0_i32_0 = arith.constant 0 : i32
    %c0_i32_1 = arith.constant 0 : i32
    %c0_i32_2 = arith.constant 0 : i32
    return %c0_i32, %c0_i32_0, %c0_i32_1 : i32, i32, i32
  }
  func.func @transform_6(%arg0: i32) -> (i32, i32, i32) {
    %c0_i32 = arith.constant 0 : i32
    %c0_i32_0 = arith.constant 0 : i32
    %c0_i32_1 = arith.constant 0 : i32
    %c0_i32_2 = arith.constant 0 : i32
    return %c0_i32, %c0_i32_0, %c0_i32_1 : i32, i32, i32
  }
  func.func @transform_7(%arg0: i32) -> (i32, i32, i32) {
    %c0_i32 = arith.constant 0 : i32
    %c0_i32_0 = arith.constant 0 : i32
    %c0_i32_1 = arith.constant 0 : i32
    %c0_i32_2 = arith.constant 0 : i32
    return %c0_i32, %c0_i32_0, %c0_i32_1 : i32, i32, i32
  }
  func.func @transform_8(%arg0: i32) -> (i32, i32, i32) {
    %c0_i32 = arith.constant 0 : i32
    %c0_i32_0 = arith.constant 0 : i32
    %c0_i32_1 = arith.constant 0 : i32
    %c0_i32_2 = arith.constant 0 : i32
    return %c0_i32, %c0_i32_0, %c0_i32_1 : i32, i32, i32
  }
  func.func @transform_9(%arg0: i32) -> (i32, i32, i32) {
    %c0_i32 = arith.constant 0 : i32
    %c0_i32_0 = arith.constant 0 : i32
    %c0_i32_1 = arith.constant 0 : i32
    %c0_i32_2 = arith.constant 0 : i32
    return %c0_i32, %c0_i32_0, %c0_i32_1 : i32, i32, i32
  }
  func.func @transform_10(%arg0: i32) -> (i32, i32, i32) {
    %c0_i32 = arith.constant 0 : i32
    %c0_i32_0 = arith.constant 0 : i32
    %c0_i32_1 = arith.constant 0 : i32
    %c0_i32_2 = arith.constant 0 : i32
    return %c0_i32, %c0_i32_0, %c0_i32_1 : i32, i32, i32
  }
  func.func @transform_11(%arg0: i32) -> (i32, i32, i32) {
    %c0_i32 = arith.constant 0 : i32
    %c0_i32_0 = arith.constant 0 : i32
    %c0_i32_1 = arith.constant 0 : i32
    %c0_i32_2 = arith.constant 0 : i32
    return %c0_i32, %c0_i32_0, %c0_i32_1 : i32, i32, i32
  }
  func.func @transform_12(%arg0: i32) -> (i32, i32, i32) {
    %c0_i32 = arith.constant 0 : i32
    %c0_i32_0 = arith.constant 0 : i32
    %c0_i32_1 = arith.constant 0 : i32
    %c0_i32_2 = arith.constant 0 : i32
    return %c0_i32, %c0_i32_0, %c0_i32_1 : i32, i32, i32
  }
  func.func @transform_13(%arg0: i32) -> (i32, i32, i32) {
    %c0_i32 = arith.constant 0 : i32
    %c0_i32_0 = arith.constant 0 : i32
    %c0_i32_1 = arith.constant 0 : i32
    %c0_i32_2 = arith.constant 0 : i32
    return %c0_i32, %c0_i32_0, %c0_i32_1 : i32, i32, i32
  }
  func.func @transform_14(%arg0: i32) -> (i32, i32, i32) {
    %c0_i32 = arith.constant 0 : i32
    %c0_i32_0 = arith.constant 0 : i32
    %c0_i32_1 = arith.constant 0 : i32
    %c0_i32_2 = arith.constant 0 : i32
    return %c0_i32, %c0_i32_0, %c0_i32_1 : i32, i32, i32
  }
  func.func @transform_15(%arg0: i32) -> (i32, i32, i32) {
    %c0_i32 = arith.constant 0 : i32
    %c0_i32_0 = arith.constant 0 : i32
    %c0_i32_1 = arith.constant 0 : i32
    %c0_i32_2 = arith.constant 0 : i32
    return %c0_i32, %c0_i32_0, %c0_i32_1 : i32, i32, i32
  }
  func.func @transform_16(%arg0: i32) -> (i32, i32, i32) {
    %c0_i32 = arith.constant 0 : i32
    %c0_i32_0 = arith.constant 0 : i32
    %c0_i32_1 = arith.constant 0 : i32
    %c0_i32_2 = arith.constant 0 : i32
    return %c0_i32, %c0_i32_0, %c0_i32_1 : i32, i32, i32
  }
  func.func @transform_17(%arg0: i32) -> (i32, i32, i32) {
    %c0_i32 = arith.constant 0 : i32
    %c0_i32_0 = arith.constant 0 : i32
    %c0_i32_1 = arith.constant 0 : i32
    return %arg0, %c0_i32, %c0_i32_0 : i32, i32, i32
  }
}

</mosaic_0001>

<bundles_post_ra>
// kernel: vit_backbone_forward.1
= control target key start
LH: loop header
LB: loop body
LE: loop exit
PB: predicated region body
PF: predicated region fallthrough
CT: control target
= control target key end

     0   :  { %s3717_s0 = inlined_call_operand.vmem [shape: f32[2,4,768], index: 0, kind: input, shape index: {}]   ;;  %s3718_s1 = inlined_call_operand.vmem [shape: f32[768,128], index: 1, kind: input, shape index: {}]   ;;  %s3719_s2 = inlined_call_operand.vmem [shape: f32[1,128], index: 2, kind: input, shape index: {}]   ;;  %s3720_s3 = inlined_call_operand.vmem [shape: f32[1,128], index: 3, kind: input, shape index: {}]   ;;  %s3721_s4 = inlined_call_operand.vmem [shape: f32[5,128], index: 4, kind: input, shape index: {}]   ;;  %s3722_s5 = inlined_call_operand.vmem [shape: f32[2,1,128], index: 5, kind: input, shape index: {}]   ;;  %s3723_s6 = inlined_call_operand.vmem [shape: f32[2,1,128], index: 6, kind: input, shape index: {}]   ;;  %s3724_s7 = inlined_call_operand.vmem [shape: f32[2,128,384], index: 7, kind: input, shape index: {}]   ;;  %s3725_s8 = inlined_call_operand.vmem [shape: f32[2,1,384], index: 8, kind: input, shape index: {}]   ;;  %s3726_s9 = inlined_call_operand.hbm [shape: f32[2,128,128], index: 9, kind: input, shape index: {}]   ;;  %s3727_s10 = inlined_call_operand.vmem [shape: f32[2,1,128], index: 10, kind: input, shape index: {}]   ;;  %s3728_s11 = inlined_call_operand.vmem [shape: f32[2,1,128], index: 11, kind: input, shape index: {}]   ;;  %s3729_s12 = inlined_call_operand.vmem [shape: f32[2,1,128], index: 12, kind: input, shape index: {}]   ;;  %s3730_s13 = inlined_call_operand.hbm [shape: f32[2,128,256], index: 13, kind: input, shape index: {}]   ;;  %s3731_s14 = inlined_call_operand.vmem [shape: f32[2,1,256], index: 14, kind: input, shape index: {}]   ;;  %s3732_s15 = inlined_call_operand.hbm [shape: f32[2,256,128], index: 15, kind: input, shape index: {}]   ;;  %s3733_s16 = inlined_call_operand.vmem [shape: f32[2,1,128], index: 16, kind: input, shape index: {}]   ;;  %s3734_s17 = inlined_call_operand.hbm [shape: f32[2,1,128], index: 17, kind: output, shape index: {}]  }
   0x1   :  { %3745 = sst [smem:[#allocation19_spill]] %s3717_s0 }
   0x2   :  { %3746 = sst [smem:[#allocation20_spill]] %s3718_s1 }
   0x3   :  { %3747 = sst [smem:[#allocation21_spill]] %s3726_s9 }
   0x4   :  { %3748 = sst [smem:[#allocation22_spill]] %s3730_s13 }
   0x5   :  { %3749 = sst [smem:[#allocation23_spill]] %s3734_s17 }
   0x6   :  { %22 = vsyncpa [#allocation3], 0 }
   0x7   :  { %23 = vsyncpa [#allocation6], 0 }
   0x8   :  { %24 = vsyncpa [#allocation4], 0 }
   0x9   :  { %26 = vsyncpa [#allocation4 + $0x1], 0  ;;  %s2767_s24 = smov 0   ;;  %s2769_s25 = smov 0  }
   0xa   :  { %s2771_s26 = smov 0   ;;  %s2773_s27 = smov 0  }
   0xb LB: > { %3750 = sst [smem:[#allocation12_spill]] %s2653_s24  ;;  %s2788_s28 = sadd.s32 4294967295, %s2665_s27   ;;  %s2665_s27 = sphi %s2773_s27, %s3770_s27   ;;  %s2661_s26 = sphi %s2771_s26, %s3772_s26   ;;  %s2657_s25 = sphi %s2769_s25, %s3774_s25   ;;  %s2653_s24 = sphi %s2767_s24, %s3773_s24  }
   0xc   : > { %3751 = sst [smem:[#allocation13_spill]] %s2661_s26  ;;  %s2285_s29 = sadd.s32 4294967294, %s2665_s27  }
   0xd   : > { %3752 = sst [smem:[#allocation14_spill]] %s2665_s27  ;;  %s2792_s0 = sadd.s32 1, %s2665_s27  }
   0xe   : > { %3753 = sst [smem:[#allocation15_spill]] %s2792_s0  ;;  %s401_s30 = sadd.s32 1, %s2661_s26 }
   0xf   : > { %s398_s18 = ssub.s32 %s2665_s27, %s2792_s0  ;;  %p411_p0 = scmp.ne.s32.totalorder %s2661_s26, %s2657_s25 }
  0x10   : > { %p399_p1 = scmp.eq.s32.totalorder %s398_s18, 0  ;;  %p412_p2 = scmp.eq.s32.totalorder %s2788_s28, 1 }
  0x11   : > { %p417_p3 = scmp.ne.s32.totalorder %s2657_s25, %s2653_s24  ;;  %p418_p4 = scmp.eq.s32.totalorder %s2285_s29, 1 }
  0x12   : > { %s2803_s19 = scalar_select %p399_p1, %s2661_s26, %s401_s30  }
  0x13   : > { %p2805_p5 = por %p412_p2, %p411_p0  ;;  %p2809_p6 = por %p418_p4, %p417_p3 }
  0x14   : > { %3754 = sst [smem:[#allocation16_spill]] %s2803_s19  ;;  %p2286_p7 = scmp.ge.s32.totalorder %s2665_s27, 1 }
  0x15   : > { %s3755_s1 = scalar_select %p2805_p5, 1, 0 }
  0x16   : > { %s3757_s20 = scalar_select %p2809_p6, 1, 0 }
  0x17   : > { %3756 = sst [smem:[#allocation17_spill]] %s3755_s1  ;;  %p425_p8 = scmp.lt.s32.totalorder %s2665_s27, 3 }
  0x18   : > { %3758 = sst [smem:[#allocation18_spill]] %s3757_s20  ;;  %p2407_p9 = scmp.eq.s32.totalorder %s2788_s28, 0 }
  0x19   : > { %p2816_p10 = pnand %p2286_p7, %p425_p8  ;;  %s3760_s13 = sld [smem:[#allocation22_spill]] }
  0x1a   : > { %s2667_s30 = smov [#allocation5]   ;;  %s3762_s9 = sld [smem:[#allocation21_spill]] }
  0x1b   : > { %p2393_p11 = pneg %p2816_p10  ;;  %s485_s18 = sshll.u32 %s2667_s30, 4  ;;  %s486_s18 = int_to_ptr.vmem [resolvable:$true] %s485_s18 }
  0x1c   : > { %s2668_s22 = smov 256   ;;  %s2669_s23 = smov 16  }
  0x1d   : > { %p2827_p12 = pnand %p2407_p9, %p2393_p11  ;;  %s2671_s24 = smov 128  }
  0x1e   : > { %s2672_s27 = smov 8   ;;  %s500_s26 = sshll.u32 %s3732_s15, 4  ;;  %s501_s26 = int_to_ptr.hbm [resolvable:$true] %s500_s26 }
  0x1f   : > { %s483_s29 = sshll.u32 %s3760_s13, 4  ;;  %s2670_s13 = smov [#allocation2]   ;;  %s484_s29 = int_to_ptr.hbm [resolvable:$true] %s483_s29 }
  0x20   : > { %s460_s20 = sshll.u32 %s3762_s9, 4  ;;  %s462_s30 = sshll.u32 %s2670_s13, 4  ;;  %s461_s20 = int_to_ptr.hbm [resolvable:$true] %s460_s20  ;;  %s463_s30 = int_to_ptr.vmem [resolvable:$true] %s462_s30 }
  0x21   : > { %2399 = dma.hbm_to_vmem [thread:$0]  (!%p2827_p12), %s484_s29, 8192, %s486_s18, [#allocation6], %s2668_s22, %s2668_s22, %s2669_s23  }
  0x22   : > { %2396 = dma.hbm_to_vmem [thread:$0]  (!%p2827_p12), %s461_s20, 4096, %s463_s30, [#allocation3], %s2671_s24, %s2671_s24, %s2672_s27  }
  0x23   : > { %s2673_s0 = smov [#allocation7]   ;;  %529 = sbr.rel (%p2816_p10) target bundleno = 4086 (0xff6), region = 88 }
  0x24   : > { %s502_s9 = sshll.u32 %s2673_s0, 4  ;;  %s503_s9 = int_to_ptr.vmem [resolvable:$true] %s502_s9 }
  0x25   : > { %2402 = dma.hbm_to_vmem [thread:$0]  (!%p2827_p12), %s501_s26, 8192, %s503_s9, [#allocation6], %s2671_s24, %s2671_s24, %s2672_s27  }
  0x28   : > { %2640 = dma.done.wait (%p2407_p9), [#allocation3], 4096  }
  0x29   : > { %2642 = vsyncadd (%p2407_p9), [#allocation3], 4294963200 }
  0x2a   : > { %2644 = dma.done.wait (%p2407_p9), [#allocation6], 16384  }
  0x2b   : > { %2646 = vsyncadd (%p2407_p9), [#allocation6], 4294950912  ;;  %s3763_s1 = sld [smem:[#allocation20_spill]]  ;;  %p591_p13 = scmp.lt.s32.totalorder %s2788_s28, 1  ;;  %vm847_vm0 = vcmask 1040384   ;;  %vm851_vm1 = vcmask 1044480  }
  0x2c   : > { %s3764_s0 = sld [smem:[#allocation19_spill]]  ;;  %vm1021_vm6 = vcmask 523264   ;;  %s2675_s30 = smov 64   ;;  %vm1049_vm7 = vcmask 36864   ;;  %vm1074_vm12 = vcmask 39936  }
  0x2d   : > { %s2956_s20 = scalar_select %p591_p13, %s2788_s28, 1 }
  0x2e   : > { %s3765_s22 = sld [smem:[#allocation23_spill]] }
  0x2f   : > { %s2378_s18 = smul.u32 24, %s2956_s20 }
  0x31   : > { %v614_v0 = vld [vmem:[%s3763_s1 + $0x78] sm:$0xff]  ;;  %v613_v1 = vld [vmem:[%s3763_s1 + $0x70] sm:$0xff]  ;;  %v612_v4 = vld [vmem:[%s3763_s1 + $0x68] sm:$0xff] }
  0x32   : > { %v630_v2 = vld [vmem:[%s3763_s1 + $0xf8] sm:$0xff]  ;;  %719 = vmatpush.msra.mxu0 %v614_v0  ;;  %v629_v3 = vld [vmem:[%s3763_s1 + $0xf0] sm:$0xff]  ;;  %v628_v5 = vld [vmem:[%s3763_s1 + $0xe8] sm:$0xff]  ;;  %s3010_s13 = scalar_lea.vmem %s3764_s0, %s2378_s18  ;;  %s589_s18 = sand.u32 1, %s2657_s25  }
  0x33   : > { %739 = vmatpush.msra.mxu1 %v630_v2  ;;  %v611_v6 = vld [vmem:[%s3763_s1 + $0x60] sm:$0xff]  ;;  %v610_v8 = vld [vmem:[%s3763_s1 + $0x58] sm:$0xff]  ;;  %v609_v10 = vld [vmem:[%s3763_s1 + $0x50] sm:$0xff]  ;;  %s2187_s17 = scalar_lea.sflag [#allocation4], %s589_s18 }
  0x34   : > { %720 = vmatpush.msra.mxu0 %v613_v1  ;;  %v627_v7 = vld [vmem:[%s3763_s1 + $0xe0] sm:$0xff]  ;;  %v626_v9 = vld [vmem:[%s3763_s1 + $0xd8] sm:$0xff]  ;;  %v625_v12 = vld [vmem:[%s3763_s1 + $0xd0] sm:$0xff]  ;;  %s2195_s23 = scalar_lea.hbm %s3765_s22, %s2788_s28  ;;  %s2615_s27 = scalar_lea.hbm %s3765_s22, 2 }
  0x35   : > { %740 = vmatpush.msra.mxu1 %v629_v3  ;;  %v646_v11 = vld [vmem:[%s3763_s1 + $0x178] sm:$0xff]  ;;  %v645_v13 = vld [vmem:[%s3763_s1 + $0x170] sm:$0xff]  ;;  %v644_v15 = vld [vmem:[%s3763_s1 + $0x168] sm:$0xff]  ;;  %s2199_s0 = sshll.u32 %s2195_s23, 4  ;;  %s2200_s0 = int_to_ptr.hbm [resolvable:$true] %s2199_s0 }
  0x36   : > { %721 = vmatpush.msra.mxu0 %v612_v4  ;;  %759 = vmatpush.msra.mxu2 %v646_v11  ;;  %v662_v14 = vld [vmem:[%s3763_s1 + $0x1f8] sm:$0xff]  ;;  %v661_v16 = vld [vmem:[%s3763_s1 + $0x1f0] sm:$0xff]  ;;  %v608_v17 = vld [vmem:[%s3763_s1 + $0x48] sm:$0xff]  ;;  %s2609_s9 = sshra.s32 %s2200_s0, 4  ;;  %s2610_s9 = int_to_ptr.hbm [resolvable:$true] %s2609_s9 }
  0x37   : > { %741 = vmatpush.msra.mxu1 %v628_v5  ;;  %v624_v18 = vld [vmem:[%s3763_s1 + $0xc8] sm:$0xff]  ;;  %779 = vmatpush.msra.mxu3 %v662_v14  ;;  %v643_v19 = vld [vmem:[%s3763_s1 + $0x160] sm:$0xff]  ;;  %v642_v23 = vld [vmem:[%s3763_s1 + $0x158] sm:$0xff]  ;;  %s2611_s20 = scalar_lea.hbm %s2610_s9, 1  ;;  %p2616_p3 = scmp.lt.s32.totalorder %s2610_s9, %s3765_s22 }
  0x38   : > { %722 = vmatpush.msra.mxu0 %v611_v6  ;;  %760 = vmatpush.msra.mxu2 %v645_v13  ;;  %v660_v20 = vld [vmem:[%s3763_s1 + $0x1e8] sm:$0xff]  ;;  %v607_v21 = vld [vmem:[%s3763_s1 + $0x40] sm:$0xff]  ;;  %v606_v25 = vld [vmem:[%s3763_s1 + $0x38] sm:$0xff]  ;;  %p2612_p0 = scmp.ne.s32.totalorder %s2610_s9, %s2611_s20  ;;  %p2617_p4 = scmp.lt.s32.totalorder %s2615_s27, %s2611_s20 }
  0x39   : > { %742 = vmatpush.msra.mxu1 %v627_v7  ;;  %v623_v22 = vld [vmem:[%s3763_s1 + $0xc0] sm:$0xff]  ;;  %780 = vmatpush.msra.mxu3 %v661_v16  ;;  %v622_v26 = vld [vmem:[%s3763_s1 + $0xb8] sm:$0xff]  ;;  %v641_v27 = vld [vmem:[%s3763_s1 + $0x150] sm:$0xff] }
  0x3a   : > { %723 = vmatpush.msra.mxu0 %v610_v8  ;;  %761 = vmatpush.msra.mxu2 %v644_v15  ;;  %v659_v24 = vld [vmem:[%s3763_s1 + $0x1e0] sm:$0xff]  ;;  %v658_v28 = vld [vmem:[%s3763_s1 + $0x1d8] sm:$0xff]  ;;  %v605_v29 = vld [vmem:[%s3763_s1 + $0x30] sm:$0xff]  ;;  %p2613_p1 = pnand %p2612_p0, %p2805_p5  ;;  %p2618_p7 = por %p2617_p4, %p2616_p3 }
  0x3b   : > { %743 = vmatpush.msra.mxu1 %v626_v9  ;;  %781 = vmatpush.msra.mxu3 %v660_v20  ;;  %v621_v30 = vld [vmem:[%s3763_s1 + $0xb0] sm:$0xff]  ;;  %v640_v31 = vld [vmem:[%s3763_s1 + $0x148] sm:$0xff]  ;;  %v639_v35 = vld [vmem:[%s3763_s1 + $0x140] sm:$0xff] }
  0x3c   : > { %724 = vmatpush.msra.mxu0 %v609_v10  ;;  %762 = vmatpush.msra.mxu2 %v643_v19  ;;  %v657_v32 = vld [vmem:[%s3763_s1 + $0x1d0] sm:$0xff]  ;;  %v604_v33 = vld [vmem:[%s3763_s1 + $0x28] sm:$0xff]  ;;  %v603_v37 = vld [vmem:[%s3763_s1 + $0x20] sm:$0xff]  ;;  %p2614_p2 = pneg %p2613_p1 }
  0x3d   : > { %744 = vmatpush.msra.mxu1 %v625_v12  ;;  %782 = vmatpush.msra.mxu3 %v659_v24  ;;  %v620_v34 = vld [vmem:[%s3763_s1 + $0xa8] sm:$0xff]  ;;  %v619_v38 = vld [vmem:[%s3763_s1 + $0xa0] sm:$0xff]  ;;  %v638_v39 = vld [vmem:[%s3763_s1 + $0x138] sm:$0xff] }
  0x3e   : > { %725 = vmatpush.msra.mxu0 %v608_v17  ;;  %763 = vmatpush.msra.mxu2 %v642_v23  ;;  %v656_v36 = vld [vmem:[%s3763_s1 + $0x1c8] sm:$0xff]  ;;  %v655_v40 = vld [vmem:[%s3763_s1 + $0x1c0] sm:$0xff]  ;;  %v602_v41 = vld [vmem:[%s3763_s1 + $0x18] sm:$0xff]  ;;  %p2619_p8 = pnand %p2618_p7, %p2614_p2 }
  0x3f   : > { %745 = vmatpush.msra.mxu1 %v624_v18  ;;  %783 = vmatpush.msra.mxu3 %v658_v28  ;;  %v618_v42 = vld [vmem:[%s3763_s1 + $0x98] sm:$0xff]  ;;  %v637_v43 = vld [vmem:[%s3763_s1 + $0x130] sm:$0xff]  ;;  %v636_v47 = vld [vmem:[%s3763_s1 + $0x128] sm:$0xff] }
  0x40   : > { %726 = vmatpush.msra.mxu0 %v607_v21  ;;  %764 = vmatpush.msra.mxu2 %v641_v27  ;;  %v654_v44 = vld [vmem:[%s3763_s1 + $0x1b8] sm:$0xff]  ;;  %v601_v45 = vld [vmem:[%s3763_s1 + $0x10] sm:$0xff]  ;;  %v600_v49 = vld [vmem:[%s3763_s1 + $0x8] sm:$0xff] }
  0x41   : > { %746 = vmatpush.msra.mxu1 %v623_v22  ;;  %784 = vmatpush.msra.mxu3 %v657_v32  ;;  %v617_v46 = vld [vmem:[%s3763_s1 + $0x90] sm:$0xff]  ;;  %v616_v50 = vld [vmem:[%s3763_s1 + $0x88] sm:$0xff]  ;;  %v635_v51 = vld [vmem:[%s3763_s1 + $0x120] sm:$0xff] }
  0x42   : > { %727 = vmatpush.msra.mxu0 %v606_v25  ;;  %765 = vmatpush.msra.mxu2 %v640_v31  ;;  %v653_v48 = vld [vmem:[%s3763_s1 + $0x1b0] sm:$0xff]  ;;  %v652_v52 = vld [vmem:[%s3763_s1 + $0x1a8] sm:$0xff]  ;;  %v599_v53 = vld [vmem:[%s3763_s1] sm:$0xff] }
  0x43   : > { %747 = vmatpush.msra.mxu1 %v622_v26  ;;  %785 = vmatpush.msra.mxu3 %v656_v36  ;;  %v615_v54 = vld [vmem:[%s3763_s1 + $0x80] sm:$0xff]  ;;  %v597_v55 = vld [vmem:[%s3010_s13 + $0x8] sm:$0xff]  ;;  %v678_v56 = vld [vmem:[%s3763_s1 + $0x278] sm:$0xff] }
  0x44   : > { %728 = vmatpush.msra.mxu0 %v605_v29  ;;  %766 = vmatpush.msra.mxu2 %v639_v35  ;;  %v694_v57 = vld [vmem:[%s3763_s1 + $0x2f8] sm:$0xff]  ;;  %704 = vst [vmem:[#allocation1 + $0x10] ss:$2 sm:$0xff] %v597_v55  ;;  %v596_v58 = vld [vmem:[%s3010_s13] sm:$0xff]  ;;  %v677_v59 = vld [vmem:[%s3763_s1 + $0x270] sm:$0xff] }
  0x45   : > { %748 = vmatpush.msra.mxu1 %v621_v30  ;;  %786 = vmatpush.msra.mxu3 %v655_v40  ;;  %v634_v60 = vld [vmem:[%s3763_s1 + $0x118] sm:$0xff]  ;;  %v651_v61 = vld [vmem:[%s3763_s1 + $0x1a0] sm:$0xff]  ;;  %702 = vst [vmem:[#allocation1] ss:$2 sm:$0xff] %v596_v58  ;;  %v676_v62 = vld [vmem:[%s3763_s1 + $0x268] sm:$0xff] }
  0x46   : > { %729 = vmatpush.msra.mxu0 %v604_v33  ;;  %767 = vmatpush.msra.mxu2 %v638_v39  ;;  %v693_v63 = vld [vmem:[%s3763_s1 + $0x2f0] sm:$0xff]  ;;  %v692_v0 = vld [vmem:[%s3763_s1 + $0x2e8] sm:$0xff]  ;;  %v650_v2 = vld [vmem:[%s3763_s1 + $0x198] sm:$0xff] }
  0x47   : > { %749 = vmatpush.msra.mxu1 %v620_v34  ;;  %787 = vmatpush.msra.mxu3 %v654_v44  ;;  %v633_v1 = vld [vmem:[%s3763_s1 + $0x110] sm:$0xff]  ;;  %v675_v4 = vld [vmem:[%s3763_s1 + $0x260] sm:$0xff]  ;;  %v632_v6 = vld [vmem:[%s3763_s1 + $0x108] sm:$0xff] }
  0x48   : > { %730 = vmatpush.msra.mxu0 %v603_v37  ;;  %768 = vmatpush.msra.mxu2 %v637_v43  ;;  %v598_v3 = vld [vmem:[%s3010_s13 + $0x10] sm:$0xff]  ;;  %v691_v5 = vld [vmem:[%s3763_s1 + $0x2e0] sm:$0xff]  ;;  %v674_v8 = vld [vmem:[%s3763_s1 + $0x258] sm:$0xff]  ;;  %s590_s13 = scalar_lea.vmem [#allocation8], %s589_s18 }
  0x49   : > { %750 = vmatpush.msra.mxu1 %v619_v38  ;;  %788 = vmatpush.msra.mxu3 %v653_v48  ;;  %v649_v7 = vld [vmem:[%s3763_s1 + $0x190] sm:$0xff]  ;;  %706 = vst [vmem:[#allocation1 + $0x20] ss:$2 sm:$0xff] %v598_v3  ;;  %v690_v9 = vld [vmem:[%s3763_s1 + $0x2d8] sm:$0xff]  ;;  %v631_v10 = vld [vmem:[%s3763_s1 + $0x100] sm:$0xff]  ;;  %s2197_s26 = sshll.u32 %s590_s13, 4  ;;  %s2198_s26 = int_to_ptr.vmem [resolvable:$true] %s2197_s26 }
  0x4a   : > { %731 = vmatpush.msra.mxu0 %v602_v41  ;;  %769 = vmatpush.msra.mxu2 %v636_v47  ;;  %v648_v11 = vld [vmem:[%s3763_s1 + $0x188] sm:$0xff]  ;;  %v673_v12 = vld [vmem:[%s3763_s1 + $0x250] sm:$0xff]  ;;  %v647_v15 = vld [vmem:[%s3763_s1 + $0x180] sm:$0xff] }
  0x4b   : > { %751 = vmatpush.msra.mxu1 %v618_v42  ;;  %789 = vmatpush.msra.mxu3 %v652_v52  ;;  %v689_v13 = vld [vmem:[%s3763_s1 + $0x2d0] sm:$0xff]  ;;  %v710_v17 = vld.sshfl [vmem:[#allocation1 + $0x18] sm:$0xff pattern:$0x75316420]  ;;  %v672_v18 = vld [vmem:[%s3763_s1 + $0x248] sm:$0xff] }
  0x4c   : > { %732 = vmatpush.msra.mxu0 %v601_v45  ;;  %770 = vmatpush.msra.mxu2 %v635_v51  ;;  %v709_v14 = vld.sshfl [vmem:[#allocation1 + $0x10] sm:$0xff pattern:$0x75316420]  ;;  %v707_v16 = vld.sshfl [vmem:[#allocation1] sm:$0xff pattern:$0x75316420] }
  0x4d   : > { %752 = vmatpush.msra.mxu1 %v617_v46  ;;  %790 = vmatpush.msra.mxu3 %v651_v61  ;;  %v688_v19 = vld [vmem:[%s3763_s1 + $0x2c8] sm:$0xff]  ;;  %v671_v21 = vld [vmem:[%s3763_s1 + $0x240] sm:$0xff]  ;;  %v670_v23 = vld [vmem:[%s3763_s1 + $0x238] sm:$0xff] }
  0x4e   : > { %733 = vmatpush.msra.mxu0 %v600_v49  ;;  %771 = vmatpush.msra.mxu2 %v634_v60  ;;  %v708_v20 = vld.sshfl [vmem:[#allocation1 + $0x8] sm:$0xff pattern:$0x75316420]  ;;  %v687_v22 = vld [vmem:[%s3763_s1 + $0x2c0] sm:$0xff]  ;;  %v686_v24 = vld [vmem:[%s3763_s1 + $0x2b8] sm:$0xff] }
  0x4f   : > { %753 = vmatpush.msra.mxu1 %v616_v50  ;;  %791 = vmatpush.msra.mxu3 %v650_v2  ;;  %v669_v25 = vld [vmem:[%s3763_s1 + $0x230] sm:$0xff]  ;;  %v668_v27 = vld [vmem:[%s3763_s1 + $0x228] sm:$0xff]  ;;  %v667_v29 = vld [vmem:[%s3763_s1 + $0x220] sm:$0xff] }
  0x50   : > { %734 = vmatpush.msra.mxu0 %v599_v53  ;;  %772 = vmatpush.msra.mxu2 %v633_v1  ;;  %v685_v26 = vld [vmem:[%s3763_s1 + $0x2b0] sm:$0xff]  ;;  %v684_v28 = vld [vmem:[%s3763_s1 + $0x2a8] sm:$0xff]  ;;  %v683_v30 = vld [vmem:[%s3763_s1 + $0x2a0] sm:$0xff] }
  0x51   : > { %754 = vmatpush.msra.mxu1 %v615_v54  ;;  %792 = vmatpush.msra.mxu3 %v649_v7  ;;  %v666_v31 = vld [vmem:[%s3763_s1 + $0x218] sm:$0xff]  ;;  %v665_v33 = vld [vmem:[%s3763_s1 + $0x210] sm:$0xff]  ;;  %v664_v35 = vld [vmem:[%s3763_s1 + $0x208] sm:$0xff] }
  0x52   : > { %799 = vmatpush.msrb.mxu0 %v678_v56  ;;  %773 = vmatpush.msra.mxu2 %v632_v6  ;;  %v682_v32 = vld [vmem:[%s3763_s1 + $0x298] sm:$0xff]  ;;  %v681_v34 = vld [vmem:[%s3763_s1 + $0x290] sm:$0xff]  ;;  %v680_v36 = vld [vmem:[%s3763_s1 + $0x288] sm:$0xff] }
  0x53   : > { %819 = vmatpush.msrb.mxu1 %v694_v57  ;;  %793 = vmatpush.msra.mxu3 %v648_v11  ;;  %v663_v37 = vld [vmem:[%s3763_s1 + $0x200] sm:$0xff]  ;;  %v712_v40 = vld.sshfl [vmem:[#allocation1 + $0x28] sm:$0xff pattern:$0x75316420]  ;;  %v936_v1 = vld [vmem:[%s3724_s7 + $0x178] sm:$0xff] }
  0x54   : > { %800 = vmatpush.msrb.mxu0 %v677_v59  ;;  %774 = vmatpush.msra.mxu2 %v631_v10  ;;  %v679_v38 = vld [vmem:[%s3763_s1 + $0x280] sm:$0xff]  ;;  %v931_v2 = vld [vmem:[%s3724_s7 + $0x150] sm:$0xff]  ;;  %v932_v3 = vld [vmem:[%s3724_s7 + $0x158] sm:$0xff] }
  0x55   : > { %820 = vmatpush.msrb.mxu1 %v693_v63  ;;  %775 = vmatmul.f32.vlgmr.msra.gmra.mxu2 %v709_v14  ;;  %v711_v39 = vld.sshfl [vmem:[#allocation1 + $0x20] sm:$0xff pattern:$0x75316420]  ;;  %v934_v63 = vld [vmem:[%s3724_s7 + $0x168] sm:$0xff] }
  0x56   : > { %801 = vmatpush.msrb.mxu0 %v676_v62  ;;  %794 = vmatpush.msra.mxu3 %v647_v15  ;;  %v2456_v41 = vld [vmem:[%s3719_s2] ss:$0 sm:$0xff]  ;;  %v842_v53 = vld [vmem:[%s3721_s4 + $0x1] sm:$0xf]  ;;  %v2674_v62 = vmov 128.0  }
  0x57   : > { %821 = vmatpush.msrb.mxu1 %v692_v0  ;;  %735 = vmatmul.f32.vlgmr.msra.gmra.mxu0 %v707_v16  ;;  %v839_v54 = vld [vmem:[%s3720_s3] sm:$0x1]  ;;  %2469 = vrcp.f32 %v2674_v62  ;;  %v935_v0 = vld [vmem:[%s3724_s7 + $0x170] sm:$0xff]  ;;  %v928_v16 = vld [vmem:[%s3724_s7 + $0x138] sm:$0xff] }
  0x58   : > { %802 = vmatpush.msrb.mxu0 %v675_v4  ;;  %795 = vmatmul.f32.vlgmr.msra.gmra.mxu3 %v710_v17  ;;  %v840_v55 = vld [vmem:[%s3721_s4] sm:$0x1] }
  0x59   : > { %822 = vmatpush.msrb.mxu1 %v691_v5  ;;  %v841_v58 = vadd.f32 %v840_v55, %v839_v54  ;;  %945 = vmatpush.msrb.mxu2 %v934_v63  ;;  %v933_v4 = vld [vmem:[%s3724_s7 + $0x160] sm:$0xff]  ;;  %v894_v54 = vld [vmem:[%s3724_s7 + $0x28] sm:$0xff] }
  0x5a   : > { %803 = vmatpush.msrb.mxu0 %v674_v8  ;;  %755 = vmatmul.f32.vlgmr.msra.gmra.mxu1 %v708_v20  ;;  %v929_v17 = vld [vmem:[%s3724_s7 + $0x140] sm:$0xff]  ;;  %v926_v20 = vld [vmem:[%s3724_s7 + $0x128] sm:$0xff] }
  0x5b   : > { %823 = vmatpush.msrb.mxu1 %v690_v9  ;;  %965 = vmatpush.msrb.mxu3 %v935_v0  ;;  %v889_v55 = vld [vmem:[%s3724_s7] sm:$0xff] }
  0x5c   : > { %804 = vmatpush.msrb.mxu0 %v673_v12  ;;  %946 = vmatpush.msrb.mxu2 %v931_v2 }
  0x5d   : > { %824 = vmatpush.msrb.mxu1 %v689_v13  ;;  %v2470_v5 = vpop.eup %2469  ;;  %966 = vmatpush.msrb.mxu3 %v932_v3 }
  0x5e   : > { %805 = vmatpush.msrb.mxu0 %v672_v18  ;;  %v856_v6 = vmul.f32 128.0, %v2470_v5  ;;  %vm860_vm2 = vweird.f32 %v2470_v5  ;;  %v930_v18 = vld [vmem:[%s3724_s7 + $0x148] sm:$0xff]  ;;  %947 = vmatpush.msrb.mxu2 %v928_v16 }
  0x5f   : > { %825 = vmatpush.msrb.mxu1 %v688_v19  ;;  %967 = vmatpush.msrb.mxu3 %v929_v17  ;;  %v925_v19 = vld [vmem:[%s3724_s7 + $0x120] sm:$0xff] }
  0x60   : > { %806 = vmatpush.msrb.mxu0 %v671_v21  ;;  %v857_v7 = vsub.f32 1.0, %v856_v6  ;;  %v927_v21 = vld [vmem:[%s3724_s7 + $0x130] sm:$0xff]  ;;  %948 = vmatpush.msrb.mxu2 %v925_v19 }
  0x61   : > { %826 = vmatpush.msrb.mxu1 %v687_v22  ;;  %968 = vmatpush.msrb.mxu3 %v926_v20  ;;  %v922_v22 = vld [vmem:[%s3724_s7 + $0x108] sm:$0xff] }
  0x62   : > { %807 = vmatpush.msrb.mxu0 %v670_v23  ;;  %v858_v8 = vmul.f32 %v2470_v5, %v857_v7  ;;  %v923_v23 = vld [vmem:[%s3724_s7 + $0x110] sm:$0xff]  ;;  %949 = vmatpush.msrb.mxu2 %v922_v22  ;;  %v2458_v7 = vld [vmem:[%s3723_s6] ss:$0 sm:$0xff] }
  0x63   : > { %827 = vmatpush.msrb.mxu1 %v686_v24  ;;  %v924_v24 = vld [vmem:[%s3724_s7 + $0x118] sm:$0xff]  ;;  %969 = vmatpush.msrb.mxu3 %v923_v23 }
  0x64   : > { %808 = vmatpush.msrb.mxu0 %v669_v25  ;;  %v859_v9 = vadd.f32 %v2470_v5, %v858_v8  ;;  %v919_v25 = vld [vmem:[%s3724_s7 + $0xf0] sm:$0xff] }
  0x65   : > { %828 = vmatpush.msrb.mxu1 %v685_v26  ;;  %v920_v26 = vld [vmem:[%s3724_s7 + $0xf8] sm:$0xff]  ;;  %950 = vmatpush.msrb.mxu2 %v919_v25 }
  0x66   : > { %809 = vmatpush.msrb.mxu0 %v668_v27  ;;  %v3190_v10 = vsel %vm860_vm2, %v2470_v5, %v859_v9  ;;  %v921_v27 = vld [vmem:[%s3724_s7 + $0x100] sm:$0xff]  ;;  %970 = vmatpush.msrb.mxu3 %v920_v26 }
  0x67   : > { %829 = vmatpush.msrb.mxu1 %v684_v28  ;;  %v916_v28 = vld [vmem:[%s3724_s7 + $0xd8] sm:$0xff] }
  0x68   : > { %810 = vmatpush.msrb.mxu0 %v667_v29  ;;  %v917_v29 = vld [vmem:[%s3724_s7 + $0xe0] sm:$0xff]  ;;  %951 = vmatpush.msrb.mxu2 %v916_v28 }
  0x69   : > { %830 = vmatpush.msrb.mxu1 %v683_v30  ;;  %v918_v30 = vld [vmem:[%s3724_s7 + $0xe8] sm:$0xff]  ;;  %971 = vmatpush.msrb.mxu3 %v917_v29 }
  0x6a   : > { %811 = vmatpush.msrb.mxu0 %v666_v31  ;;  %v913_v31 = vld [vmem:[%s3724_s7 + $0xc0] sm:$0xff] }
  0x6b   : > { %831 = vmatpush.msrb.mxu1 %v682_v32  ;;  %v914_v32 = vld [vmem:[%s3724_s7 + $0xc8] sm:$0xff]  ;;  %952 = vmatpush.msrb.mxu2 %v913_v31 }
  0x6c   : > { %812 = vmatpush.msrb.mxu0 %v665_v33  ;;  %v915_v33 = vld [vmem:[%s3724_s7 + $0xd0] sm:$0xff]  ;;  %972 = vmatpush.msrb.mxu3 %v914_v32 }
  0x6d   : > { %832 = vmatpush.msrb.mxu1 %v681_v34  ;;  %v910_v34 = vld [vmem:[%s3724_s7 + $0xa8] sm:$0xff] }
  0x6e   : > { %813 = vmatpush.msrb.mxu0 %v664_v35  ;;  %v911_v35 = vld [vmem:[%s3724_s7 + $0xb0] sm:$0xff]  ;;  %953 = vmatpush.msrb.mxu2 %v910_v34 }
  0x6f   : > { %833 = vmatpush.msrb.mxu1 %v680_v36  ;;  %v912_v36 = vld [vmem:[%s3724_s7 + $0xb8] sm:$0xff]  ;;  %973 = vmatpush.msrb.mxu3 %v911_v35 }
  0x70   : > { %814 = vmatpush.msrb.mxu0 %v663_v37  ;;  %v907_v37 = vld [vmem:[%s3724_s7 + $0x90] sm:$0xff] }
  0x71   : > { %834 = vmatpush.msrb.mxu1 %v679_v38  ;;  %815 = vmatmul.f32.vlgmr.msrb.gmra.mxu0 %v711_v39  ;;  %v908_v38 = vld [vmem:[%s3724_s7 + $0x98] sm:$0xff]  ;;  %v909_v39 = vld [vmem:[%s3724_s7 + $0xa0] sm:$0xff] }
  0x72   : > { %835 = vmatmul.f32.vlgmr.msrb.gmra.mxu1 %v712_v40  ;;  %985 = vmatpush.msra.mxu0 %v936_v1  ;;  %v904_v40 = vld [vmem:[%s3724_s7 + $0x78] sm:$0xff] }
  0x73   : > { %954 = vmatpush.msrb.mxu2 %v907_v37  ;;  %974 = vmatpush.msrb.mxu3 %v908_v38 }
  0x74   : > { %986 = vmatpush.msra.mxu0 %v933_v4  ;;  %v2457_v4 = vld [vmem:[%s3722_s5] ss:$0 sm:$0xff] }
  0x75   : > { %955 = vmatpush.msrb.mxu2 %v904_v40 }
  0x76   : > { %987 = vmatpush.msra.mxu0 %v930_v18 }
  0x78   : > { %988 = vmatpush.msra.mxu0 %v927_v21 }
  0x7a   : > { %989 = vmatpush.msra.mxu0 %v924_v24 }
  0x7c   : > { %990 = vmatpush.msra.mxu0 %v921_v27 }
  0x7e   : > { %991 = vmatpush.msra.mxu0 %v918_v30 }
  0x80   : > { %992 = vmatpush.msra.mxu0 %v915_v33 }
  0x82   : > { %993 = vmatpush.msra.mxu0 %v912_v36 }
  0x84   : > { %994 = vmatpush.msra.mxu0 %v909_v39 }
  0xd4   : > { %v736_v42 = vpop.f32.mrf.mxu0 }
  0xd5   : > { %v737_v43 = vadd.f32 %v2456_v41, %v736_v42  ;;  %v905_v41 = vld [vmem:[%s3724_s7 + $0x80] sm:$0xff]  ;;  %v906_v42 = vld [vmem:[%s3724_s7 + $0x88] sm:$0xff] }
  0xd6   : > { %975 = vmatpush.msrb.mxu3 %v905_v41  ;;  %995 = vmatpush.msra.mxu0 %v906_v42 }
  0xd7   : > { %v756_v44 = vpop.f32.mrf.mxu1 }
  0xd8   : > { %v757_v45 = vadd.f32 %v756_v44, %v737_v43  ;;  %v776_v46 = vpop.f32.mrf.mxu2  ;;  %v901_v43 = vld [vmem:[%s3724_s7 + $0x60] sm:$0xff]  ;;  %v902_v44 = vld [vmem:[%s3724_s7 + $0x68] sm:$0xff] }
  0xd9   : > { %956 = vmatpush.msrb.mxu2 %v901_v43  ;;  %976 = vmatpush.msrb.mxu3 %v902_v44 }
  0xda   : > { %v777_v47 = vadd.f32 %v776_v46, %v757_v45  ;;  %v903_v45 = vld [vmem:[%s3724_s7 + $0x70] sm:$0xff]  ;;  %v898_v46 = vld [vmem:[%s3724_s7 + $0x48] sm:$0xff] }
  0xdb   : > { %v796_v48 = vpop.f32.mrf.mxu3  ;;  %996 = vmatpush.msra.mxu0 %v903_v45  ;;  %957 = vmatpush.msrb.mxu2 %v898_v46 }
  0xdc   : > { %v797_v49 = vadd.f32 %v796_v48, %v777_v47  ;;  %v899_v47 = vld [vmem:[%s3724_s7 + $0x50] sm:$0xff]  ;;  %v900_v48 = vld [vmem:[%s3724_s7 + $0x58] sm:$0xff] }
  0xdd   : > { %977 = vmatpush.msrb.mxu3 %v899_v47  ;;  %997 = vmatpush.msra.mxu0 %v900_v48 }
  0xee   : > { %v816_v50 = vpop.f32.mrf.mxu0 }
  0xef   : > { %v836_v51 = vpop.f32.mrf.mxu1  ;;  %v817_v52 = vadd.f32 %v816_v50, %v797_v49  ;;  %v895_v49 = vld [vmem:[%s3724_s7 + $0x30] sm:$0xff]  ;;  %v896_v50 = vld [vmem:[%s3724_s7 + $0x38] sm:$0xff] }
  0xf0   : > { %958 = vmatpush.msrb.mxu2 %v895_v49  ;;  %978 = vmatpush.msrb.mxu3 %v896_v50 }
  0xf1   : > { %v837_v56 = vadd.f32 %v836_v51, %v817_v52  ;;  %v897_v51 = vld [vmem:[%s3724_s7 + $0x40] sm:$0xff]  ;;  %v892_v52 = vld [vmem:[%s3724_s7 + $0x18] sm:$0xff] }
  0xf2   : > { %998 = vmatpush.msra.mxu0 %v897_v51  ;;  %959 = vmatpush.msrb.mxu2 %v892_v52  ;;  %v1012_v52 = vld [vmem:[#allocation2 + $0x38] sm:$0xff] }
  0xf3   : > { %v843_v57 = vadd.f32 %v842_v53, %v837_v56  ;;  %v893_v53 = vld [vmem:[%s3724_s7 + $0x20] sm:$0xff]  ;;  %v890_v56 = vld [vmem:[%s3724_s7 + $0x8] sm:$0xff] }
  0xf4   : > { %979 = vmatpush.msrb.mxu3 %v893_v53  ;;  %999 = vmatpush.msra.mxu0 %v894_v54  ;;  %v1011_v53 = vld [vmem:[#allocation2 + $0x30] sm:$0xff]  ;;  %v1010_v54 = vld [vmem:[#allocation2 + $0x28] sm:$0xff] }
  0xf5   : > { %v845_v59 = vrot.slane %v843_v57, 7  ;;  %v891_v57 = vld [vmem:[%s3724_s7 + $0x10] sm:$0xff]  ;;  %960 = vmatpush.msrb.mxu2 %v889_v55  ;;  %v1009_v55 = vld [vmem:[#allocation2 + $0x20] sm:$0xff] }
  0xf6   : > { %980 = vmatpush.msrb.mxu3 %v890_v56  ;;  %1000 = vmatpush.msra.mxu0 %v891_v57  ;;  %v1008_v56 = vld [vmem:[#allocation2 + $0x18] sm:$0xff]  ;;  %v1007_v57 = vld [vmem:[#allocation2 + $0x10] sm:$0xff] }
  0xf7   : > { %v3168_v60 = vsel %vm847_vm0, %v841_v58, %v845_v59 }
  0xf8   : > { %v852_v61 = vsel %vm851_vm1, %v3168_v60, 0.0 }
  0xf9   : > { %853 = vadd.xlane.f32.xlu0 %v852_v61 }
 0x16c   : > { %v854_v11 = vpop.xlane.xlu0 %853 }
 0x16d   : > { %v862_v12 = vmul.f32 %v3190_v10, %v854_v11  ;;  %v937_v11 = vld [vmem:[%s3725_s8] sm:$0x7] }
 0x16e   : > { %v940_v16 = vperm.slane %v937_v11, 1 }
 0x16f   : > { %v3194_v13 = vsub.f32 %v3168_v60, %v862_v12  ;;  %v941_v12 = vperm.slane %v937_v11, 2 }
 0x171   : > { %v864_v14 = vmul.f32 %v3194_v13, %v3194_v13 }
 0x173   : > { %v865_v15 = vsel %vm851_vm1, %v864_v14, 0.0 }
 0x174   : > { %866 = vadd.xlane.f32.xlu0 %v865_v15 }
 0x1e7   : > { %v867_v58 = vpop.xlane.xlu0 %866 }
 0x1e8   : > { %v868_v59 = vmul.f32 %v867_v58, %v3190_v10  ;;  %v1006_v58 = vld [vmem:[#allocation2 + $0x8] sm:$0xff] }
 0x1ea   : > { %v869_v61 = vadd.f32 1e-12, %v868_v59  ;;  %v1005_v59 = vld [vmem:[#allocation2] sm:$0xff] }
 0x1ec   : > { %2471 = vrsqrt.f32 %v869_v61  ;;  %vm876_vm4 = vweird.f32 %v869_v61 }
 0x1f2   : > { %v2472_v62 = vpop.eup %2471 }
 0x1f3   : > { %v871_v63 = vmul.f32 %v2472_v62, %v869_v61  ;;  %vm877_vm3 = vweird.f32 %v2472_v62 }
 0x1f4   : > { %vm878_vm5 = vmor %vm876_vm4, %vm877_vm3 }
 0x1f5   : > { %v872_v0 = vmul.f32 %v2472_v62, %v871_v63  ;;  %v1019_v63 = vld [vmem:[#allocation2 + $0x70] sm:$0xff] }
 0x1f7   : > { %v873_v1 = vmul.f32 0.5, %v872_v0  ;;  %v1018_v0 = vld [vmem:[#allocation2 + $0x68] sm:$0xff] }
 0x1f9   : > { %v874_v2 = vsub.f32 1.5, %v873_v1  ;;  %v1017_v1 = vld [vmem:[#allocation2 + $0x60] sm:$0xff] }
 0x1fb   : > { %v875_v3 = vmul.f32 %v2472_v62, %v874_v2  ;;  %v1016_v2 = vld [vmem:[#allocation2 + $0x58] sm:$0xff] }
 0x1fd   : > { %v879_v5 = vsel %vm878_vm5, %v2472_v62, %v875_v3  ;;  %v1020_v62 = vld [vmem:[#allocation2 + $0x78] sm:$0xff] }
 0x1fe   : > { %v880_v6 = vmul.f32 %v879_v5, %v3194_v13  ;;  %v939_v13 = vperm.slane %v937_v11, 0  ;;  %v1015_v5 = vld [vmem:[#allocation2 + $0x50] sm:$0xff] }
 0x200   : > { %v884_v8 = vmul.f32 %v2457_v4, %v880_v6 }
 0x202   : > { %v888_v9 = vadd.f32 %v2458_v7, %v884_v8  ;;  %v1014_v7 = vld [vmem:[#allocation2 + $0x48] sm:$0xff] }
 0x204   : > { %961 = vmatmul.f32.vlgmr.msrb.gmra.mxu2 %v888_v9  ;;  %981 = vmatmul.f32.vlgmr.msrb.gmra.mxu3 %v888_v9 }
 0x205   : > { %1001 = vmatmul.f32.vlgmr.msra.gmra.mxu0 %v888_v9 }
 0x282   : > { %v1002_v14 = vpop.f32.mrf.mxu0 }
 0x283   : > { %v1003_v15 = vadd.f32 %v1002_v14, %v941_v12 }
 0x285   : > { %2298 = vmatpush.msk.msra.mxu2 %vm851_vm1, %v1003_v15 }
 0x287   : > { %v982_v17 = vpop.f32.mrf.mxu3  ;;  %v962_v18 = vpop.f32.mrf.mxu2  ;;  %1192 = vmatpush.msrb.mxu2 %v1020_v62  ;;  %v1265_v62 = vld [vmem:[#allocation5] sm:$0xff] }
 0x288   : > { %v983_v19 = vadd.f32 %v982_v17, %v940_v16  ;;  %v963_v20 = vadd.f32 %v962_v18, %v939_v13  ;;  %v1013_v18 = vld [vmem:[#allocation2 + $0x40] sm:$0xff] }
 0x289   : > { %1193 = vmatpush.msrb.mxu2 %v1019_v63  ;;  %v1266_v63 = vld [vmem:[#allocation5 + $0x8] sm:$0xff] }
 0x28a   : > { %1103 = vrot.lane.b32.xlu1 %v983_v19, %s2675_s30  ;;  %2296 = vmatpush.xpose.msk.msra.mxu3 %vm1021_vm6, %v983_v19 }
 0x28b   : > { %1194 = vmatpush.msrb.mxu2 %v1018_v0 }
 0x28d   : > { %2297 = vmatmul.msk.f32.vlgmr.msra.gmra.mxu3 %vm1021_vm6, %v963_v20  ;;  %1195 = vmatpush.msrb.mxu2 %v1017_v1 }
 0x28f   : > { %1196 = vmatpush.msrb.mxu2 %v1016_v2 }
 0x291   : > { %1197 = vmatpush.msrb.mxu2 %v1015_v5 }
 0x292   : > { %1101 = vrot.lane.b32.xlu1 %v963_v20, %s2675_s30  ;;  %v2459_v20 = vld [vmem:[%s3727_s10] ss:$0 sm:$0xff] }
 0x293   : > { %1198 = vmatpush.msrb.mxu2 %v1014_v7 }
 0x295   : > { %1199 = vmatpush.msrb.mxu2 %v1013_v18  ;;  %v1445_v18 = vld [vmem:[#allocation7 + $0x70] sm:$0xff] }
 0x2fc   : > { %v1104_v21 = vpop.permute.xlu1 %1103 }
 0x2fd   : > { %2300 = vmatpush.xpose.msk.msrb.mxu3 %vm1021_vm6, %v1104_v21 }
 0x301   : > { %1215 = vmatpush.msra.mxu3 %v1012_v52  ;;  %v1276_v52 = vld [vmem:[#allocation5 + $0x58] sm:$0xff] }
 0x303   : > { %1216 = vmatpush.msra.mxu3 %v1011_v53  ;;  %v1273_v53 = vld [vmem:[#allocation5 + $0x40] sm:$0xff] }
 0x304   : > { %v1102_v22 = vpop.permute.xlu1 %1101 }
 0x305   : > { %2301 = vmatmul.msk.f32.vlgmr.msrb.gmra.mxu3 %vm1021_vm6, %v1102_v22 }
 0x306   : > { %1217 = vmatpush.msra.mxu3 %v1010_v54  ;;  %v1274_v54 = vld [vmem:[#allocation5 + $0x48] sm:$0xff] }
 0x308   : > { %1218 = vmatpush.msra.mxu3 %v1009_v55  ;;  %v1271_v55 = vld [vmem:[#allocation5 + $0x30] sm:$0xff] }
 0x30a   : > { %1219 = vmatpush.msra.mxu3 %v1008_v56  ;;  %v1272_v56 = vld [vmem:[#allocation5 + $0x38] sm:$0xff] }
 0x30c   : > { %1220 = vmatpush.msra.mxu3 %v1007_v57  ;;  %v1269_v57 = vld [vmem:[#allocation5 + $0x20] sm:$0xff] }
 0x30e   : > { %1221 = vmatpush.msra.mxu3 %v1006_v58  ;;  %v1270_v58 = vld [vmem:[#allocation5 + $0x28] sm:$0xff] }
 0x310   : > { %v1045_v23 = vpop.f32.mrf.mxu3  ;;  %1222 = vmatpush.msra.mxu3 %v1005_v59  ;;  %v1267_v59 = vld [vmem:[#allocation5 + $0x10] sm:$0xff] }
 0x311   : > { %v1048_v24 = vmul.f32 0.125, %v1045_v23 }
 0x313   : > { %v1050_v25 = vsel %vm1049_vm7, %v1048_v24, -inf }
 0x314   : > { %1051 = vmax.xlane.f32.xlu2 %v1050_v25 }
 0x387   : > { %v1052_v26 = vpop.xlane.xlu2 %1051 }
 0x388   : > { %v1053_v27 = vsub.f32 %v1048_v24, %v1052_v26  ;;  %v1126_v28 = vpop.f32.mrf.mxu3 }
 0x389   : > { %v1129_v29 = vmul.f32 0.125, %v1126_v28  ;;  %v1296_v28 = vld [vmem:[#allocation5 + $0xf8] sm:$0xff] }
 0x38a   : > { %v1054_v30 = vmul.f32 1.442695, %v1053_v27  ;;  %v1295_v27 = vld [vmem:[#allocation5 + $0xf0] sm:$0xff] }
 0x38b   : > { %v1130_v31 = vsel %vm1049_vm7, %v1129_v29, -inf }
 0x38c   : > { %2473 = vpow2.f32 %v1054_v30  ;;  %1131 = vmax.xlane.f32.xlu2 %v1130_v31  ;;  %v1294_v30 = vld [vmem:[#allocation5 + $0xe8] sm:$0xff] }
 0x392   : > { %v2474_v32 = vpop.eup %2473 }
 0x393   : > { %v1056_v33 = vsel %vm1049_vm7, %v2474_v32, 0.0 }
 0x394   : > { %1057 = vadd.xlane.f32.xlu0 %v1056_v33 }
 0x3a4   : > { %1154 = vrot.lane.b32.xlu2 %v1003_v15, %s2675_s30 }
 0x3ff   : > { %v1132_v34 = vpop.xlane.xlu2 %1131 }
 0x400   : > { %v1133_v35 = vsub.f32 %v1129_v29, %v1132_v34  ;;  %v1293_v29 = vld [vmem:[#allocation5 + $0xe0] sm:$0xff] }
 0x402   : > { %v1134_v36 = vmul.f32 1.442695, %v1133_v35  ;;  %v1291_v35 = vld [vmem:[#allocation5 + $0xd0] sm:$0xff] }
 0x404   : > { %2475 = vpow2.f32 %v1134_v36  ;;  %v1292_v36 = vld [vmem:[#allocation5 + $0xd8] sm:$0xff] }
 0x407   : > { %v1058_v37 = vpop.xlane.xlu0 %1057  ;;  %v1155_v38 = vpop.permute.xlu2 %1154 }
 0x408   : > { %2477 = vrcp.f32 %v1058_v37  ;;  %2302 = vmatpush.msk.msra.mxu1 %vm851_vm1, %v1155_v38  ;;  %v1070_v44 = vand.u32 2147483648, %v1058_v37  ;;  %v1068_v46 = vand.u32 2147483647, %v1058_v37  ;;  %vm1064_vm9 = vweird.f32 %v1058_v37  ;;  %v1290_v38 = vld [vmem:[#allocation5 + $0xc8] sm:$0xff] }
 0x40a   : > { %v3348_v39 = vpop.eup %2475  ;;  %v1071_v48 = vor.u32 1.1754944e-38, %v1070_v44  ;;  %vm1069_vm11 = vcmp.eq.f32.partialorder %v1068_v46, 8.507059e+37  ;;  %1303 = vmatpush.msrb.mxu1 %v1295_v27  ;;  %v1284_v44 = vld [vmem:[#allocation5 + $0x98] sm:$0xff]  ;;  %v1282_v46 = vld [vmem:[#allocation5 + $0x88] sm:$0xff] }
 0x40b   : > { %v1136_v40 = vsel %vm1049_vm7, %v3348_v39, 0.0 }
 0x40c   : > { %1137 = vadd.xlane.f32.xlu1 %v1136_v40  ;;  %1304 = vmatpush.msrb.mxu1 %v1293_v29  ;;  %v1288_v40 = vld [vmem:[#allocation5 + $0xb8] sm:$0xff]  ;;  %v1460_v29 = vld [vmem:[#allocation7 + $0xe8] sm:$0xff] }
 0x40e   : > { %v2478_v41 = vpop.eup %2477  ;;  %1305 = vmatpush.msrb.mxu1 %v1291_v35  ;;  %v1439_v35 = vld [vmem:[#allocation7 + $0x40] sm:$0xff] }
 0x40f   : > { %v1060_v42 = vmul.f32 %v2478_v41, %v1058_v37  ;;  %vm1065_vm8 = vweird.f32 %v2478_v41  ;;  %v1289_v37 = vld [vmem:[#allocation5 + $0xc0] sm:$0xff] }
 0x410   : > { %vm1066_vm10 = vmor %vm1064_vm9, %vm1065_vm8  ;;  %1306 = vmatpush.msrb.mxu1 %v1289_v37 }
 0x411   : > { %v1061_v43 = vsub.f32 1.0, %v1060_v42  ;;  %v1286_v42 = vld [vmem:[#allocation5 + $0xa8] sm:$0xff] }
 0x413   : > { %v1062_v45 = vmul.f32 %v2478_v41, %v1061_v43  ;;  %v1283_v43 = vld [vmem:[#allocation5 + $0x90] sm:$0xff] }
 0x415   : > { %v1063_v47 = vadd.f32 %v2478_v41, %v1062_v45  ;;  %v1281_v45 = vld [vmem:[#allocation5 + $0x80] sm:$0xff] }
 0x417   : > { %v1067_v49 = vsel %vm1066_vm10, %v2478_v41, %v1063_v47  ;;  %v1285_v41 = vld [vmem:[#allocation5 + $0xa0] sm:$0xff]  ;;  %v1279_v47 = vld [vmem:[#allocation5 + $0x70] sm:$0xff] }
 0x418   : > { %v1072_v50 = vsel %vm1069_vm11, %v1071_v48, %v1067_v49  ;;  %v1280_v48 = vld [vmem:[#allocation5 + $0x78] sm:$0xff]  ;;  %v1277_v49 = vld [vmem:[#allocation5 + $0x60] sm:$0xff] }
 0x419   : > { %v1073_v51 = vmul.f32 %v2474_v32, %v1072_v50  ;;  %v1278_v50 = vld [vmem:[#allocation5 + $0x68] sm:$0xff] }
 0x41b   : > { %2299 = vmatmul.msk.f32.vlgmr.msra.gmra.mxu2 %vm1074_vm12, %v1073_v51  ;;  %v1275_v51 = vld [vmem:[#allocation5 + $0x50] sm:$0xff] }
 0x41c   : > { %1323 = vmatpush.msra.mxu2 %v1296_v28  ;;  %v1441_v28 = vld [vmem:[#allocation7 + $0x50] sm:$0xff] }
 0x41e   : > { %1324 = vmatpush.msra.mxu2 %v1294_v30 }
 0x420   : > { %1325 = vmatpush.msra.mxu2 %v1292_v36  ;;  %v1458_v36 = vld [vmem:[#allocation7 + $0xd8] sm:$0xff] }
 0x422   : > { %1326 = vmatpush.msra.mxu2 %v1290_v38 }
 0x424   : > { %1327 = vmatpush.msra.mxu2 %v1288_v40  ;;  %v1457_v40 = vld [vmem:[#allocation7 + $0xd0] sm:$0xff] }
 0x426   : > { %1328 = vmatpush.msra.mxu2 %v1286_v42 }
 0x428   : > { %1329 = vmatpush.msra.mxu2 %v1284_v44  ;;  %v1437_v44 = vld [vmem:[#allocation7 + $0x30] sm:$0xff] }
 0x42a   : > { %1330 = vmatpush.msra.mxu2 %v1282_v46 }
 0x42c   : > { %1331 = vmatpush.msra.mxu2 %v1280_v48 }
 0x42e   : > { %1332 = vmatpush.msra.mxu2 %v1278_v50  ;;  %v1455_v50 = vld [vmem:[#allocation7 + $0xc0] sm:$0xff] }
 0x430   : > { %1333 = vmatpush.msra.mxu2 %v1276_v52 }
 0x432   : > { %1334 = vmatpush.msra.mxu2 %v1274_v54  ;;  %v1435_v54 = vld [vmem:[#allocation7 + $0x20] sm:$0xff] }
 0x434   : > { %1335 = vmatpush.msra.mxu2 %v1272_v56 }
 0x436   : > { %1336 = vmatpush.msra.mxu2 %v1270_v58 }
 0x47f   : > { %v1138_v61 = vpop.xlane.xlu1 %1137 }
 0x480   : > { %2479 = vrcp.f32 %v1138_v61  ;;  %v1150_v8 = vand.u32 2147483648, %v1138_v61  ;;  %v1148_v11 = vand.u32 2147483647, %v1138_v61  ;;  %vm1144_vm14 = vweird.f32 %v1138_v61 }
 0x482   : > { %v1151_v14 = vor.u32 1.1754944e-38, %v1150_v8  ;;  %vm1149_vm0 = vcmp.eq.f32.partialorder %v1148_v11, 8.507059e+37 }
 0x486   : > { %v2480_v3 = vpop.eup %2479 }
 0x487   : > { %v1140_v4 = vmul.f32 %v2480_v3, %v1138_v61  ;;  %vm1145_vm13 = vweird.f32 %v2480_v3  ;;  %v1268_v61 = vld [vmem:[#allocation5 + $0x18] sm:$0xff] }
 0x488   : > { %vm1146_vm15 = vmor %vm1144_vm14, %vm1145_vm13  ;;  %1337 = vmatpush.msra.mxu2 %v1268_v61  ;;  %v1434_v61 = vld [vmem:[#allocation7 + $0x18] sm:$0xff] }
 0x489   : > { %v1141_v6 = vsub.f32 1.0, %v1140_v4 }
 0x48a   : > { %1338 = vmatpush.msra.mxu2 %v1266_v63 }
 0x48b   : > { %v1142_v9 = vmul.f32 %v2480_v3, %v1141_v6 }
 0x48d   : > { %v1143_v12 = vadd.f32 %v2480_v3, %v1142_v9  ;;  %v2460_v9 = vld [vmem:[%s3728_s11] ss:$0 sm:$0xff] }
 0x48f   : > { %v1147_v15 = vsel %vm1146_vm15, %v2480_v3, %v1143_v12 }
 0x490   : > { %v1152_v16 = vsel %vm1149_vm0, %v1151_v14, %v1147_v15  ;;  %v2461_v14 = vld [vmem:[%s3729_s12] ss:$0 sm:$0xff] }
 0x491   : > { %v1153_v13 = vmul.f32 %v3348_v39, %v1152_v16  ;;  %v1287_v39 = vld [vmem:[#allocation5 + $0xb0] sm:$0xff] }
 0x492   : > { %1307 = vmatpush.msrb.mxu1 %v1287_v39  ;;  %v1438_v39 = vld [vmem:[#allocation7 + $0x38] sm:$0xff] }
 0x493   : > { %2303 = vmatmul.msk.f32.vlgmr.msra.gmra.mxu1 %vm1074_vm12, %v1153_v13  ;;  %v1446_v13 = vld [vmem:[#allocation7 + $0x78] sm:$0xff] }
 0x494   : > { %1308 = vmatpush.msrb.mxu1 %v1285_v41  ;;  %1463 = vmatpush.msrb.mxu3 %v1446_v13 }
 0x496   : > { %1309 = vmatpush.msrb.mxu1 %v1283_v43  ;;  %1464 = vmatpush.msrb.mxu3 %v1445_v18 }
 0x498   : > { %1310 = vmatpush.msrb.mxu1 %v1281_v45  ;;  %v1456_v45 = vld [vmem:[#allocation7 + $0xc8] sm:$0xff] }
 0x49a   : > { %1311 = vmatpush.msrb.mxu1 %v1279_v47 }
 0x49c   : > { %1312 = vmatpush.msrb.mxu1 %v1277_v49  ;;  %v1436_v49 = vld [vmem:[#allocation7 + $0x28] sm:$0xff] }
 0x49e   : > { %v1098_v17 = vpop.f32.mrf.mxu2  ;;  %1313 = vmatpush.msrb.mxu1 %v1275_v51 }
 0x49f   : > { %2305 = vmatmul.msk.f32.vlgmr.msra.gmra.mxu3 %vm1021_vm6, %v1098_v17  ;;  %v1297_v17 = vld [vmem:[%s3731_s14] sm:$0x3] }
 0x4a0   : > { %1314 = vmatpush.msrb.mxu1 %v1273_v53 }
 0x4a2   : > { %1315 = vmatpush.msrb.mxu1 %v1271_v55  ;;  %v1454_v55 = vld [vmem:[#allocation7 + $0xb8] sm:$0xff] }
 0x4a4   : > { %1316 = vmatpush.msrb.mxu1 %v1269_v57 }
 0x4a6   : > { %1317 = vmatpush.msrb.mxu1 %v1267_v59 }
 0x4a8   : > { %1318 = vmatpush.msrb.mxu1 %v1265_v62  ;;  %v1453_v62 = vld [vmem:[#allocation7 + $0xb0] sm:$0xff] }
 0x510   : > { %v1178_v19 = vpop.f32.mrf.mxu1 }
 0x511   : > { %2304 = vmatmul.msk.f32.vlgmr.msrb.gmra.mxu2 %vm1021_vm6, %v1178_v19  ;;  %v1444_v19 = vld [vmem:[#allocation7 + $0x68] sm:$0xff] }
 0x512   : > { %1465 = vmatpush.msrb.mxu3 %v1444_v19  ;;  %v1449_v19 = vld [vmem:[#allocation7 + $0x90] sm:$0xff] }
 0x522   : > { %v1224_v21 = vpop.f32.mrf.mxu3 }
 0x594   : > { %v1201_v22 = vpop.f32.mrf.mxu2 }
 0x595   : > { %v1225_v23 = vadd.f32 %v1224_v21, %v1201_v22  ;;  %v1443_v21 = vld [vmem:[#allocation7 + $0x60] sm:$0xff]  ;;  %v1462_v22 = vld [vmem:[#allocation7 + $0xf8] sm:$0xff] }
 0x596   : > { %1466 = vmatpush.msrb.mxu3 %v1443_v21  ;;  %1483 = vmatpush.msrb.mxu0 %v1462_v22  ;;  %v1448_v22 = vld [vmem:[#allocation7 + $0x88] sm:$0xff] }
 0x597   : > { %v1231_v24 = vadd.f32 %v2459_v20, %v1225_v23  ;;  %v1299_v20 = vperm.slane %v1297_v17, 0 }
 0x599   : > { %v3361_v25 = vadd.f32 %v1231_v24, %v3168_v60  ;;  %v1442_v24 = vld [vmem:[#allocation7 + $0x58] sm:$0xff] }
 0x59a   : > { %1467 = vmatpush.msrb.mxu3 %v1442_v24 }
 0x59b   : > { %v1235_v26 = vsel %vm851_vm1, %v3361_v25, 0.0 }
 0x59c   : > { %1236 = vadd.xlane.f32.xlu0 %v1235_v26  ;;  %v1461_v26 = vld [vmem:[#allocation7 + $0xf0] sm:$0xff]  ;;  %1468 = vmatpush.msrb.mxu3 %v1441_v28 }
 0x59d   : > { %1484 = vmatpush.msrb.mxu0 %v1461_v26  ;;  %v1447_v26 = vld [vmem:[#allocation7 + $0x80] sm:$0xff] }
 0x59f   : > { %1485 = vmatpush.msrb.mxu0 %v1460_v29 }
 0x60f   : > { %v1237_v31 = vpop.xlane.xlu0 %1236 }
 0x610   : > { %v1238_v32 = vmul.f32 %v1237_v31, %v3190_v10  ;;  %v1300_v31 = vperm.slane %v1297_v17, 1 }
 0x612   : > { %v3367_v33 = vsub.f32 %v3361_v25, %v1238_v32  ;;  %v1440_v32 = vld [vmem:[#allocation7 + $0x48] sm:$0xff] }
 0x613   : > { %1469 = vmatpush.msrb.mxu3 %v1440_v32 }
 0x614   : > { %v1240_v60 = vmul.f32 %v3367_v33, %v3367_v33 }
 0x615   : > { %1470 = vmatpush.msrb.mxu3 %v1439_v35 }
 0x616   : > { %v1241_v34 = vsel %vm851_vm1, %v1240_v60, 0.0 }
 0x617   : > { %1242 = vadd.xlane.f32.xlu0 %v1241_v34  ;;  %1471 = vmatpush.msrb.mxu3 %v1438_v39 }
 0x619   : > { %1472 = vmatpush.msrb.mxu3 %v1437_v44 }
 0x61b   : > { %1473 = vmatpush.msrb.mxu3 %v1436_v49 }
 0x61d   : > { %1474 = vmatpush.msrb.mxu3 %v1435_v54 }
 0x61f   : > { %1475 = vmatpush.msrb.mxu3 %v1434_v61 }
 0x68a   : > { %v1243_v0 = vpop.xlane.xlu0 %1242 }
 0x68b   : > { %v1244_v1 = vmul.f32 %v1243_v0, %v3190_v10 }
 0x68d   : > { %v1245_v2 = vadd.f32 1e-12, %v1244_v1 }
 0x68f   : > { %2481 = vrsqrt.f32 %v1245_v2  ;;  %vm1252_vm3 = vweird.f32 %v1245_v2 }
 0x695   : > { %v2482_v3 = vpop.eup %2481 }
 0x696   : > { %v1247_v4 = vmul.f32 %v2482_v3, %v1245_v2  ;;  %vm1253_vm2 = vweird.f32 %v2482_v3  ;;  %v1433_v2 = vld [vmem:[#allocation7 + $0x10] sm:$0xff] }
 0x697   : > { %vm1254_vm4 = vmor %vm1252_vm3, %vm1253_vm2  ;;  %1476 = vmatpush.msrb.mxu3 %v1433_v2 }
 0x698   : > { %v1248_v5 = vmul.f32 %v2482_v3, %v1247_v4 }
 0x69a   : > { %v1249_v6 = vmul.f32 0.5, %v1248_v5 }
 0x69c   : > { %v1250_v7 = vsub.f32 1.5, %v1249_v6 }
 0x69e   : > { %v1251_v8 = vmul.f32 %v2482_v3, %v1250_v7 }
 0x6a0   : > { %v1255_v11 = vsel %vm1254_vm4, %v2482_v3, %v1251_v8  ;;  %v1452_v3 = vld [vmem:[#allocation7 + $0xa8] sm:$0xff] }
 0x6a1   : > { %v1256_v12 = vmul.f32 %v1255_v11, %v3367_v33  ;;  %v1459_v33 = vld [vmem:[#allocation7 + $0xe0] sm:$0xff]  ;;  %v1432_v8 = vld [vmem:[#allocation7 + $0x8] sm:$0xff] }
 0x6a2   : > { %1486 = vmatpush.msrb.mxu0 %v1459_v33  ;;  %1477 = vmatpush.msrb.mxu3 %v1432_v8 }
 0x6a3   : > { %v1260_v15 = vmul.f32 %v2460_v9, %v1256_v12  ;;  %v1451_v9 = vld [vmem:[#allocation7 + $0xa0] sm:$0xff] }
 0x6a4   : > { %1487 = vmatpush.msrb.mxu0 %v1458_v36 }
 0x6a5   : > { %v1264_v16 = vadd.f32 %v2461_v14, %v1260_v15  ;;  %v1431_v14 = vld [vmem:[#allocation7] sm:$0xff]  ;;  %v1450_v15 = vld [vmem:[#allocation7 + $0x98] sm:$0xff] }
 0x6a6   : > { %1488 = vmatpush.msrb.mxu0 %v1457_v40  ;;  %1478 = vmatpush.msrb.mxu3 %v1431_v14 }
 0x6a7   : > { %1319 = vmatmul.f32.vlgmr.msrb.gmra.mxu1 %v1264_v16  ;;  %1339 = vmatmul.f32.vlgmr.msra.gmra.mxu2 %v1264_v16 }
 0x6a8   : > { %1489 = vmatpush.msrb.mxu0 %v1456_v45 }
 0x6aa   : > { %1490 = vmatpush.msrb.mxu0 %v1455_v50 }
 0x6ac   : > { %1491 = vmatpush.msrb.mxu0 %v1454_v55 }
 0x6ae   : > { %1492 = vmatpush.msrb.mxu0 %v1453_v62 }
 0x6b0   : > { %1493 = vmatpush.msrb.mxu0 %v1452_v3 }
 0x6b2   : > { %1494 = vmatpush.msrb.mxu0 %v1451_v9 }
 0x6b4   : > { %1495 = vmatpush.msrb.mxu0 %v1450_v15  ;;  %v2462_v15 = vld [vmem:[%s3733_s16] ss:$0 sm:$0xff] }
 0x6b6   : > { %1496 = vmatpush.msrb.mxu0 %v1449_v19  ;;  %v2353_v19 = vld [vmem:[%s3724_s7 + $0x2d8] sm:$0xff] }
 0x6b8   : > { %1497 = vmatpush.msrb.mxu0 %v1448_v22 }
 0x6ba   : > { %1498 = vmatpush.msrb.mxu0 %v1447_v26 }
 0x724   : > { %v1320_v23 = vpop.f32.mrf.mxu1 }
 0x725   : > { %v3383_v27 = vadd.f32 %v1320_v23, %v1299_v20 }
 0x727   : > { %v3386_v30 = vmul.f32 0.70710677, %v3383_v27 }
 0x729   : > { %v1347_v60 = vmul.f32 %v3386_v30, %v3386_v30 }
 0x72a   : > { %v1340_v34 = vpop.f32.mrf.mxu2 }
 0x72b   : > { %v3390_v37 = vmin.f32 %v1347_v60, 16.0  ;;  %v3392_v38 = vadd.f32 %v1340_v34, %v1300_v31 }
 0x72d   : > { %v1349_v41 = vmul.f32 2.1237322e-06, %v3390_v37  ;;  %v1360_v42 = vmul.f32 3.8918573e-05, %v3390_v37  ;;  %v3397_v43 = vmul.f32 0.70710677, %v3392_v38 }
 0x72e   : > { %v1344_v8 = vmul.f32 0.5, %v3392_v38  ;;  %v2355_v38 = vld [vmem:[%s3724_s7 + $0x2e8] sm:$0xff] }
 0x72f   : > { %v1350_v46 = vadd.f32 0.00028619796, %v1349_v41  ;;  %v1361_v47 = vadd.f32 0.001143296, %v1360_v42  ;;  %v1387_v48 = vmul.f32 %v3397_v43, %v3397_v43  ;;  %1601 = vmatpush.msra.mxu1 %v2355_v38  ;;  %v2463_v38 = vld [vmem:[%s3722_s5 + $0x1] ss:$0 sm:$0xff] }
 0x731   : > { %v1351_v51 = vmul.f32 %v1350_v46, %v3390_v37  ;;  %v1362_v52 = vmul.f32 %v1361_v47, %v3390_v37  ;;  %v3403_v53 = vmin.f32 %v1387_v48, 16.0 }
 0x733   : > { %v1352_v56 = vadd.f32 0.0036580483, %v1351_v51  ;;  %v1363_v57 = vadd.f32 0.014752088, %v1362_v52  ;;  %v1389_v58 = vmul.f32 2.1237322e-06, %v3403_v53 }
 0x734   : > { %v1400_v59 = vmul.f32 3.8918573e-05, %v3403_v53 }
 0x735   : > { %v1364_v63 = vmul.f32 %v1363_v57, %v3390_v37  ;;  %v1390_v0 = vadd.f32 0.00028619796, %v1389_v58  ;;  %v1353_v5 = vmul.f32 %v1352_v56, %v3390_v37 }
 0x736   : > { %v1401_v1 = vadd.f32 0.001143296, %v1400_v59 }
 0x737   : > { %v1365_v4 = vadd.f32 0.112945676, %v1364_v63  ;;  %v1391_v6 = vmul.f32 %v1390_v0, %v3403_v53  ;;  %v1354_v17 = vadd.f32 0.05243302, %v1353_v5 }
 0x738   : > { %v1402_v7 = vmul.f32 %v1401_v1, %v3403_v53  ;;  %v1343_v1 = vmul.f32 0.5, %v3383_v27 }
 0x739   : > { %v1366_v11 = vmul.f32 %v1365_v4, %v3390_v37  ;;  %v1392_v13 = vadd.f32 0.0036580483, %v1391_v6  ;;  %v1355_v28 = vmul.f32 %v1354_v17, %v3390_v37  ;;  %v2356_v17 = vld [vmem:[%s3724_s7 + $0x2f0] sm:$0xff] }
 0x73a   : > { %v1403_v12 = vadd.f32 0.014752088, %v1402_v7  ;;  %1621 = vmatpush.msrb.mxu2 %v2356_v17 }
 0x73b   : > { %v1367_v16 = vadd.f32 0.4994258, %v1366_v11  ;;  %v1393_v24 = vmul.f32 %v1392_v13, %v3403_v53  ;;  %v1356_v33 = vadd.f32 0.18741608, %v1355_v28  ;;  %v2349_v28 = vld [vmem:[%s3724_s7 + $0x2b8] sm:$0xff] }
 0x73c   : > { %v1404_v18 = vmul.f32 %v1403_v12, %v3403_v53  ;;  %1622 = vmatpush.msrb.mxu2 %v2353_v19 }
 0x73d   : > { %v1368_v20 = vmul.f32 %v1367_v16, %v3390_v37  ;;  %v1394_v32 = vadd.f32 0.05243302, %v1393_v24  ;;  %v1357_v39 = vmul.f32 %v1356_v33, %v3390_v37  ;;  %v2347_v33 = vld [vmem:[%s3724_s7 + $0x2a8] sm:$0xff] }
 0x73e   : > { %v1405_v21 = vadd.f32 0.112945676, %v1404_v18  ;;  %v2357_v18 = vld [vmem:[%s3724_s7 + $0x2f8] sm:$0xff] }
 0x73f   : > { %v1369_v23 = vadd.f32 1.0, %v1368_v20  ;;  %v1395_v36 = vmul.f32 %v1394_v32, %v3403_v53  ;;  %v1358_v45 = vadd.f32 1.1283791, %v1357_v39  ;;  %v2354_v20 = vld [vmem:[%s3724_s7 + $0x2e0] sm:$0xff]  ;;  %1641 = vmatpush.msra.mxu3 %v2357_v18  ;;  %v2340_v39 = vld [vmem:[%s3724_s7 + $0x270] sm:$0xff] }
 0x740   : > { %v1406_v29 = vmul.f32 %v1405_v21, %v3403_v53  ;;  %v2346_v32 = vld [vmem:[%s3724_s7 + $0x2a0] sm:$0xff] }
 0x741   : > { %2483 = vrcp.f32 %v1369_v23  ;;  %v1381_v42 = vand.u32 2147483648, %v1369_v23  ;;  %v1396_v44 = vadd.f32 0.18741608, %v1395_v36  ;;  %v1379_v47 = vand.u32 2147483647, %v1369_v23  ;;  %1642 = vmatpush.msra.mxu3 %v2354_v20  ;;  %v2345_v36 = vld [vmem:[%s3724_s7 + $0x298] sm:$0xff] }
 0x742   : > { %v1407_v31 = vadd.f32 0.4994258, %v1406_v29  ;;  %vm1375_vm8 = vweird.f32 %v1369_v23  ;;  %v1359_v54 = vmul.f32 %v1358_v45, %v3386_v30  ;;  %v2350_v29 = vld [vmem:[%s3724_s7 + $0x2c0] sm:$0xff]  ;;  %v2339_v45 = vld [vmem:[%s3724_s7 + $0x268] sm:$0xff] }
 0x743   : > { %v1382_v50 = vor.u32 1.1754944e-38, %v1381_v42  ;;  %v1397_v51 = vmul.f32 %v1396_v44, %v3403_v53  ;;  %vm1380_vm10 = vcmp.eq.f32.partialorder %v1379_v47, 8.507059e+37  ;;  %1623 = vmatpush.msrb.mxu2 %v2350_v29  ;;  %v2337_v42 = vld [vmem:[%s3724_s7 + $0x258] sm:$0xff]  ;;  %v2338_v44 = vld [vmem:[%s3724_s7 + $0x260] sm:$0xff]  ;;  %v2335_v47 = vld [vmem:[%s3724_s7 + $0x248] sm:$0xff] }
 0x744   : > { %v1408_v60 = vmul.f32 %v1407_v31, %v3403_v53  ;;  %v2351_v31 = vld [vmem:[%s3724_s7 + $0x2c8] sm:$0xff] }
 0x745   : > { %v1398_v59 = vadd.f32 1.1283791, %v1397_v51  ;;  %1643 = vmatpush.msra.mxu3 %v2351_v31  ;;  %1624 = vmatpush.msrb.mxu2 %v2347_v33  ;;  %v2333_v51 = vld [vmem:[%s3724_s7 + $0x238] sm:$0xff] }
 0x746   : > { %v1409_v34 = vadd.f32 1.0, %v1408_v60  ;;  %v2348_v60 = vld [vmem:[%s3724_s7 + $0x2b0] sm:$0xff] }
 0x747   : > { %v2484_v35 = vpop.eup %2483  ;;  %v1399_v30 = vmul.f32 %v1398_v59, %v3397_v43  ;;  %1644 = vmatpush.msra.mxu3 %v2348_v60  ;;  %v2323_v59 = vld [vmem:[%s3724_s7 + $0x1e8] sm:$0xff] }
 0x748   : > { %v1371_v40 = vmul.f32 %v2484_v35, %v1369_v23  ;;  %2485 = vrcp.f32 %v1409_v34  ;;  %vm1376_vm5 = vweird.f32 %v2484_v35  ;;  %v1421_v58 = vand.u32 2147483648, %v1409_v34 }
 0x749   : > { %vm1377_vm9 = vmor %vm1375_vm8, %vm1376_vm5  ;;  %v1419_v62 = vand.u32 2147483647, %v1409_v34  ;;  %vm1415_vm13 = vweird.f32 %v1409_v34  ;;  %1645 = vmatpush.msra.mxu3 %v2345_v36 }
 0x74a   : > { %v1372_v41 = vsub.f32 1.0, %v1371_v40  ;;  %v1422_v53 = vor.u32 1.1754944e-38, %v1421_v58  ;;  %v2341_v40 = vld [vmem:[%s3724_s7 + $0x278] sm:$0xff]  ;;  %v2322_v58 = vld [vmem:[%s3724_s7 + $0x1e0] sm:$0xff] }
 0x74b   : > { %vm1420_vm15 = vcmp.eq.f32.partialorder %v1419_v62, 8.507059e+37  ;;  %v2319_v62 = vld [vmem:[%s3724_s7 + $0x1c8] sm:$0xff] }
 0x74c   : > { %v1373_v46 = vmul.f32 %v2484_v35, %v1372_v41  ;;  %v2342_v41 = vld [vmem:[%s3724_s7 + $0x280] sm:$0xff] }
 0x74d   : > { %1646 = vmatpush.msra.mxu3 %v2342_v41 }
 0x74e   : > { %v2486_v48 = vpop.eup %2485  ;;  %v1374_v49 = vadd.f32 %v2484_v35, %v1373_v46  ;;  %v2334_v46 = vld [vmem:[%s3724_s7 + $0x240] sm:$0xff] }
 0x74f   : > { %v1411_v52 = vmul.f32 %v2486_v48, %v1409_v34  ;;  %vm1416_vm11 = vweird.f32 %v2486_v48  ;;  %v2343_v34 = vld [vmem:[%s3724_s7 + $0x288] sm:$0xff]  ;;  %1647 = vmatpush.msra.mxu3 %v2339_v45 }
 0x750   : > { %v1378_v37 = vsel %vm1377_vm9, %v2484_v35, %v1374_v49  ;;  %vm1417_vm14 = vmor %vm1415_vm13, %vm1416_vm11  ;;  %v2344_v35 = vld [vmem:[%s3724_s7 + $0x290] sm:$0xff]  ;;  %v2331_v49 = vld [vmem:[%s3724_s7 + $0x228] sm:$0xff] }
 0x751   : > { %v1383_v55 = vsel %vm1380_vm10, %v1382_v50, %v1378_v37  ;;  %v1412_v56 = vsub.f32 1.0, %v1411_v52  ;;  %1625 = vmatpush.msrb.mxu2 %v2344_v35  ;;  %v2332_v50 = vld [vmem:[%s3724_s7 + $0x230] sm:$0xff]  ;;  %v2330_v37 = vld [vmem:[%s3724_s7 + $0x220] sm:$0xff] }
 0x752   : > { %v1384_v57 = vmul.f32 %v1383_v55, %v1359_v54  ;;  %v2328_v52 = vld [vmem:[%s3724_s7 + $0x210] sm:$0xff]  ;;  %v2329_v54 = vld [vmem:[%s3724_s7 + $0x218] sm:$0xff] }
 0x753   : > { %v1413_v61 = vmul.f32 %v2486_v48, %v1412_v56  ;;  %1626 = vmatpush.msrb.mxu2 %v2341_v40  ;;  %v2325_v55 = vld [vmem:[%s3724_s7 + $0x1f8] sm:$0xff]  ;;  %v2326_v56 = vld [vmem:[%s3724_s7 + $0x200] sm:$0xff] }
 0x754   : > { %v2306_v63 = vclamps-f32 %v1384_v57, 1.0  ;;  %v2327_v57 = vld [vmem:[%s3724_s7 + $0x208] sm:$0xff] }
 0x755   : > { %v1414_v0 = vadd.f32 %v2486_v48, %v1413_v61  ;;  %1627 = vmatpush.msrb.mxu2 %v2338_v44  ;;  %v2324_v61 = vld [vmem:[%s3724_s7 + $0x1f0] sm:$0xff] }
 0x756   : > { %v1427_v2 = vadd.f32 1.0, %v2306_v63  ;;  %v2320_v63 = vld [vmem:[%s3724_s7 + $0x1d0] sm:$0xff] }
 0x757   : > { %v1418_v3 = vsel %vm1417_vm14, %v2486_v48, %v1414_v0  ;;  %v2336_v48 = vld [vmem:[%s3724_s7 + $0x250] sm:$0xff]  ;;  %1628 = vmatpush.msrb.mxu2 %v2335_v47  ;;  %v2321_v0 = vld [vmem:[%s3724_s7 + $0x1d8] sm:$0xff] }
 0x758   : > { %v1429_v4 = vmul.f32 %v1427_v2, %v1343_v1  ;;  %v1423_v5 = vsel %vm1420_vm15, %v1422_v53, %v1418_v3  ;;  %1648 = vmatpush.msra.mxu3 %v2336_v48  ;;  %v2316_v1 = vld [vmem:[%s3724_s7 + $0x1b0] sm:$0xff]  ;;  %v2317_v2 = vld [vmem:[%s3724_s7 + $0x1b8] sm:$0xff]  ;;  %v2318_v53 = vld [vmem:[%s3724_s7 + $0x1c0] sm:$0xff] }
 0x759   : > { %v1424_v6 = vmul.f32 %v1423_v5, %v1399_v30  ;;  %1629 = vmatpush.msrb.mxu2 %v2332_v50  ;;  %v2313_v30 = vld [vmem:[%s3724_s7 + $0x198] sm:$0xff]  ;;  %v2314_v3 = vld [vmem:[%s3724_s7 + $0x1a0] sm:$0xff] }
 0x75a   : > { %1479 = vmatmul.f32.vlgmr.msrb.gmra.mxu3 %v1429_v4  ;;  %v2315_v4 = vld [vmem:[%s3724_s7 + $0x1a8] sm:$0xff]  ;;  %v2310_v5 = vld [vmem:[%s3724_s7 + $0x180] sm:$0xff] }
 0x75b   : > { %v2307_v7 = vclamps-f32 %v1424_v6, 1.0  ;;  %1649 = vmatpush.msra.mxu3 %v2333_v51  ;;  %1630 = vmatpush.msrb.mxu2 %v2329_v54  ;;  %v2311_v6 = vld [vmem:[%s3724_s7 + $0x188] sm:$0xff] }
 0x75d   : > { %v1428_v9 = vadd.f32 1.0, %v2307_v7  ;;  %1650 = vmatpush.msra.mxu3 %v2330_v37  ;;  %1631 = vmatpush.msrb.mxu2 %v2326_v56  ;;  %v2312_v7 = vld [vmem:[%s3724_s7 + $0x190] sm:$0xff] }
 0x75f   : > { %v1430_v11 = vmul.f32 %v1428_v9, %v1344_v8  ;;  %1651 = vmatpush.msra.mxu3 %v2327_v57  ;;  %1632 = vmatpush.msrb.mxu2 %v2323_v59 }
 0x761   : > { %1499 = vmatmul.f32.vlgmr.msrb.gmra.mxu0 %v1430_v11  ;;  %1652 = vmatpush.msra.mxu3 %v2324_v61 }
 0x762   : > { %1633 = vmatpush.msrb.mxu2 %v2320_v63 }
 0x763   : > { %1653 = vmatpush.msra.mxu3 %v2321_v0 }
 0x764   : > { %1634 = vmatpush.msrb.mxu2 %v2317_v2 }
 0x765   : > { %1654 = vmatpush.msra.mxu3 %v2318_v53 }
 0x766   : > { %1635 = vmatpush.msrb.mxu2 %v2314_v3  ;;  %v1669_v3 = vld [vmem:[#allocation2 + $0xb8] sm:$0xff] }
 0x767   : > { %1655 = vmatpush.msra.mxu3 %v2315_v4  ;;  %v1668_v4 = vld [vmem:[#allocation2 + $0xb0] sm:$0xff] }
 0x768   : > { %1636 = vmatpush.msrb.mxu2 %v2311_v6  ;;  %v1666_v6 = vld [vmem:[#allocation2 + $0xa0] sm:$0xff] }
 0x769   : > { %1656 = vmatpush.msra.mxu3 %v2312_v7  ;;  %v1665_v7 = vld [vmem:[#allocation2 + $0x98] sm:$0xff] }
 0x7dd   : > { %v1480_v12 = vpop.f32.mrf.mxu3 }
 0x7de   : > { %v1500_v14 = vpop.f32.mrf.mxu0 }
 0x7df   : > { %v1501_v27 = vadd.f32 %v1500_v14, %v1480_v12 }
 0x7e1   : > { %v1503_v43 = vadd.f32 %v1501_v27, %v3361_v25  ;;  %v2352_v25 = vld [vmem:[%s3724_s7 + $0x2d0] sm:$0xff] }
 0x7e2   : > { %1602 = vmatpush.msra.mxu1 %v2352_v25  ;;  %v2464_v25 = vld [vmem:[%s3723_s6 + $0x1] ss:$0 sm:$0xff] }
 0x7e3   : > { %v3429_v16 = vadd.f32 %v2462_v15, %v1503_v43 }
 0x7e4   : > { %1603 = vmatpush.msra.mxu1 %v2349_v28 }
 0x7e5   : > { %v1513_v13 = vsel %vm851_vm1, %v3429_v16, 0.0 }
 0x7e6   : > { %1514 = vadd.xlane.f32.xlu0 %v1513_v13  ;;  %1604 = vmatpush.msra.mxu1 %v2346_v32 }
 0x7e8   : > { %1605 = vmatpush.msra.mxu1 %v2343_v34 }
 0x7ea   : > { %1606 = vmatpush.msra.mxu1 %v2340_v39 }
 0x7ec   : > { %1607 = vmatpush.msra.mxu1 %v2337_v42 }
 0x7ee   : > { %1608 = vmatpush.msra.mxu1 %v2334_v46 }
 0x7f0   : > { %1609 = vmatpush.msra.mxu1 %v2331_v49 }
 0x7f2   : > { %1610 = vmatpush.msra.mxu1 %v2328_v52 }
 0x7f4   : > { %1611 = vmatpush.msra.mxu1 %v2325_v55 }
 0x7f6   : > { %1612 = vmatpush.msra.mxu1 %v2322_v58 }
 0x7f8   : > { %1613 = vmatpush.msra.mxu1 %v2319_v62 }
 0x7fa   : > { %1614 = vmatpush.msra.mxu1 %v2316_v1 }
 0x7fc   : > { %1615 = vmatpush.msra.mxu1 %v2313_v30 }
 0x7fe   : > { %1616 = vmatpush.msra.mxu1 %v2310_v5  ;;  %v1667_v5 = vld [vmem:[#allocation2 + $0xa8] sm:$0xff] }
 0x859   : > { %v1515_v21 = vpop.xlane.xlu0 %1514 }
 0x85a   : > { %v1516_v22 = vmul.f32 %v1515_v21, %v3190_v10  ;;  %v2358_v21 = vld [vmem:[%s3725_s8 + $0x3] sm:$0x7] }
 0x85c   : > { %v3453_v23 = vsub.f32 %v3429_v16, %v1516_v22  ;;  %v1596_v22 = vperm.slane %v2358_v21, 1 }
 0x85e   : > { %v1518_v24 = vmul.f32 %v3453_v23, %v3453_v23 }
 0x860   : > { %v1519_v26 = vsel %vm851_vm1, %v1518_v24, 0.0  ;;  %v1597_v24 = vperm.slane %v2358_v21, 2 }
 0x861   : > { %1520 = vadd.xlane.f32.xlu2 %v1519_v26  ;;  %v1595_v26 = vperm.slane %v2358_v21, 0 }
 0x8d4   : > { %v1521_v8 = vpop.xlane.xlu2 %1520 }
 0x8d5   : > { %v1522_v9 = vmul.f32 %v1521_v8, %v3190_v10  ;;  %v1664_v8 = vld [vmem:[#allocation2 + $0x90] sm:$0xff] }
 0x8d7   : > { %v1523_v11 = vadd.f32 1e-12, %v1522_v9  ;;  %v1663_v9 = vld [vmem:[#allocation2 + $0x88] sm:$0xff] }
 0x8d9   : > { %2487 = vrsqrt.f32 %v1523_v11  ;;  %vm1530_vm2 = vweird.f32 %v1523_v11 }
 0x8df   : > { %v2488_v12 = vpop.eup %2487 }
 0x8e0   : > { %v1525_v14 = vmul.f32 %v2488_v12, %v1523_v11  ;;  %vm1531_vm0 = vweird.f32 %v2488_v12  ;;  %v1662_v11 = vld [vmem:[#allocation2 + $0x80] sm:$0xff] }
 0x8e1   : > { %vm1532_vm3 = vmor %vm1530_vm2, %vm1531_vm0 }
 0x8e2   : > { %v1526_v27 = vmul.f32 %v2488_v12, %v1525_v14  ;;  %v1676_v14 = vld [vmem:[#allocation2 + $0xf0] sm:$0xff] }
 0x8e4   : > { %v1527_v15 = vmul.f32 0.5, %v1526_v27  ;;  %v1675_v27 = vld [vmem:[#allocation2 + $0xe8] sm:$0xff] }
 0x8e6   : > { %v1528_v43 = vsub.f32 1.5, %v1527_v15 }
 0x8e8   : > { %v1529_v13 = vmul.f32 %v2488_v12, %v1528_v43  ;;  %v1674_v43 = vld [vmem:[#allocation2 + $0xe0] sm:$0xff] }
 0x8ea   : > { %v1533_v17 = vsel %vm1532_vm3, %v2488_v12, %v1529_v13  ;;  %v1677_v12 = vld [vmem:[#allocation2 + $0xf8] sm:$0xff] }
 0x8eb   : > { %v1534_v18 = vmul.f32 %v1533_v17, %v3453_v23  ;;  %v1673_v13 = vld [vmem:[#allocation2 + $0xd8] sm:$0xff]  ;;  %v1671_v17 = vld [vmem:[#allocation2 + $0xc8] sm:$0xff] }
 0x8ed   : > { %v1538_v19 = vmul.f32 %v2463_v38, %v1534_v18  ;;  %v1672_v38 = vld [vmem:[#allocation2 + $0xd0] sm:$0xff] }
 0x8ef   : > { %v1542_v20 = vadd.f32 %v2464_v25, %v1538_v19 }
 0x8f1   : > { %1617 = vmatmul.f32.vlgmr.msra.gmra.mxu1 %v1542_v20  ;;  %1637 = vmatmul.f32.vlgmr.msrb.gmra.mxu2 %v1542_v20 }
 0x8f2   : > { %1657 = vmatmul.f32.vlgmr.msra.gmra.mxu3 %v1542_v20 }
 0x96e   : > { %v1618_v29 = vpop.f32.mrf.mxu1 }
 0x96f   : > { %v1619_v33 = vadd.f32 %v1618_v29, %v1595_v26 }
 0x974   : > { %v1638_v28 = vpop.f32.mrf.mxu2 }
 0x975   : > { %v1639_v31 = vadd.f32 %v1638_v28, %v1596_v22  ;;  %v1658_v23 = vpop.f32.mrf.mxu3 }
 0x976   : > { %v1659_v32 = vadd.f32 %v1658_v23, %v1597_v24  ;;  %v1670_v23 = vld [vmem:[#allocation2 + $0xc0] sm:$0xff] }
 0x977   : > { %1757 = vrot.lane.b32.xlu1 %v1639_v31, %s2675_s30  ;;  %2359 = vmatpush.xpose.msk.msra.mxu2 %vm1021_vm6, %v1639_v31 }
 0x978   : > { %2361 = vmatpush.msk.msra.mxu0 %vm851_vm1, %v1659_v32 }
 0x97a   : > { %2360 = vmatmul.msk.f32.vlgmr.msra.gmra.mxu2 %vm1021_vm6, %v1619_v33 }
 0x9e9   : > { %v1758_v60 = vpop.permute.xlu1 %1757 }
 0x9ea   : > { %2363 = vmatpush.xpose.msk.msrb.mxu0 %vm1021_vm6, %v1758_v60 }
 0x9fd   : > { %v1701_v34 = vpop.f32.mrf.mxu2 }
 0x9fe   : > { %v1704_v35 = vmul.f32 0.125, %v1701_v34 }
 0xa00   : > { %v1705_v36 = vsel %vm1049_vm7, %v1704_v35, -inf }
 0xa01   : > { %1706 = vmax.xlane.f32.xlu0 %v1705_v36 }
 0xa74   : > { %v1707_v39 = vpop.xlane.xlu0 %1706 }
 0xa75   : > { %v1708_v40 = vsub.f32 %v1704_v35, %v1707_v39 }
 0xa77   : > { %v1709_v41 = vmul.f32 1.442695, %v1708_v40 }
 0xa79   : > { %2489 = vpow2.f32 %v1709_v41  ;;  %v1953_v41 = vld [vmem:[#allocation5 + $0x1f0] sm:$0xff] }
 0xa7a   : > { %1962 = vmatpush.msrb.mxu2 %v1953_v41 }
 0xa7f   : > { %v2490_v42 = vpop.eup %2489 }
 0xa80   : > { %v1711_v44 = vsel %vm1049_vm7, %v2490_v42, 0.0 }
 0xa81   : > { %1712 = vadd.xlane.f32.xlu0 %v1711_v44  ;;  %v1951_v44 = vld [vmem:[#allocation5 + $0x1e0] sm:$0xff] }
 0xa82   : > { %1963 = vmatpush.msrb.mxu2 %v1951_v44  ;;  %v2102_v44 = vld [vmem:[#allocation7 + $0x158] sm:$0xff] }
 0xa95   : > { %1755 = vrot.lane.b32.xlu0 %v1619_v33, %s2675_s30  ;;  %v2465_v33 = vld [vmem:[%s3727_s10 + $0x1] ss:$0 sm:$0xff] }
 0xa9d   : > { %1808 = vrot.lane.b32.xlu0 %v1659_v32, %s2675_s30 }
 0xaf4   : > { %v1713_v45 = vpop.xlane.xlu0 %1712 }
 0xaf5   : > { %2491 = vrcp.f32 %v1713_v45  ;;  %v1725_v49 = vand.u32 2147483648, %v1713_v45  ;;  %v1723_v51 = vand.u32 2147483647, %v1713_v45  ;;  %vm1719_vm5 = vweird.f32 %v1713_v45 }
 0xaf7   : > { %v1726_v54 = vor.u32 1.1754944e-38, %v1725_v49  ;;  %vm1724_vm9 = vcmp.eq.f32.partialorder %v1723_v51, 8.507059e+37  ;;  %v1950_v51 = vld [vmem:[#allocation5 + $0x1d8] sm:$0xff] }
 0xafb   : > { %v2492_v46 = vpop.eup %2491 }
 0xafc   : > { %v1715_v47 = vmul.f32 %v2492_v46, %v1713_v45  ;;  %vm1720_vm4 = vweird.f32 %v2492_v46  ;;  %v1952_v45 = vld [vmem:[#allocation5 + $0x1e8] sm:$0xff] }
 0xafd   : > { %vm1721_vm8 = vmor %vm1719_vm5, %vm1720_vm4 }
 0xafe   : > { %v1716_v48 = vsub.f32 1.0, %v1715_v47 }
 0xb00   : > { %v1717_v50 = vmul.f32 %v2492_v46, %v1716_v48 }
 0xb02   : > { %v1718_v52 = vadd.f32 %v2492_v46, %v1717_v50  ;;  %v1949_v50 = vld [vmem:[#allocation5 + $0x1d0] sm:$0xff] }
 0xb03   : > { %1964 = vmatpush.msrb.mxu2 %v1949_v50 }
 0xb04   : > { %v1722_v37 = vsel %vm1721_vm8, %v2492_v46, %v1718_v52  ;;  %v1947_v52 = vld [vmem:[#allocation5 + $0x1c0] sm:$0xff] }
 0xb05   : > { %v1727_v55 = vsel %vm1724_vm9, %v1726_v54, %v1722_v37  ;;  %v1948_v54 = vld [vmem:[#allocation5 + $0x1c8] sm:$0xff]  ;;  %1965 = vmatpush.msrb.mxu2 %v1947_v52  ;;  %v1945_v37 = vld [vmem:[#allocation5 + $0x1b0] sm:$0xff] }
 0xb06   : > { %v1728_v56 = vmul.f32 %v2490_v42, %v1727_v55  ;;  %v1954_v42 = vld [vmem:[#allocation5 + $0x1f8] sm:$0xff]  ;;  %v2116_v52 = vld [vmem:[#allocation7 + $0x1c8] sm:$0xff] }
 0xb07   : > { %v1756_v57 = vpop.permute.xlu0 %1755  ;;  %1982 = vmatpush.msrb.mxu3 %v1954_v42  ;;  %v1946_v55 = vld [vmem:[#allocation5 + $0x1b8] sm:$0xff]  ;;  %1966 = vmatpush.msrb.mxu2 %v1945_v37 }
 0xb08   : > { %2362 = vmatmul.msk.f32.vlgmr.msra.gmra.mxu0 %vm1074_vm12, %v1728_v56  ;;  %v1943_v56 = vld [vmem:[#allocation5 + $0x1a0] sm:$0xff] }
 0xb09   : > { %1846 = vmatpush.msra.mxu0 %v1677_v12  ;;  %1983 = vmatpush.msrb.mxu3 %v1952_v45  ;;  %v1923_v12 = vld [vmem:[#allocation5 + $0x100] sm:$0xff]  ;;  %v2118_v45 = vld [vmem:[#allocation7 + $0x1d8] sm:$0xff] }
 0xb0a   : > { %1967 = vmatpush.msrb.mxu2 %v1943_v56  ;;  %v2115_v56 = vld [vmem:[#allocation7 + $0x1c0] sm:$0xff] }
 0xb0b   : > { %1847 = vmatpush.msra.mxu0 %v1676_v14  ;;  %1984 = vmatpush.msrb.mxu3 %v1950_v51  ;;  %v1924_v14 = vld [vmem:[#allocation5 + $0x108] sm:$0xff] }
 0xb0c   : > { %v2100_v51 = vld [vmem:[#allocation7 + $0x148] sm:$0xff] }
 0xb0d   : > { %1848 = vmatpush.msra.mxu0 %v1675_v27  ;;  %1985 = vmatpush.msrb.mxu3 %v1948_v54 }
 0xb0f   : > { %v1809_v58 = vpop.permute.xlu0 %1808  ;;  %1849 = vmatpush.msra.mxu0 %v1674_v43  ;;  %1986 = vmatpush.msrb.mxu3 %v1946_v55  ;;  %v2099_v55 = vld [vmem:[#allocation7 + $0x140] sm:$0xff] }
 0xb10   : > { %2364 = vmatmul.msk.f32.vlgmr.msrb.gmra.mxu0 %vm1021_vm6, %v1756_v57  ;;  %2365 = vmatpush.msk.msrb.mxu1 %vm851_vm1, %v1809_v58  ;;  %v1944_v57 = vld [vmem:[#allocation5 + $0x1a8] sm:$0xff]  ;;  %v1941_v58 = vld [vmem:[#allocation5 + $0x190] sm:$0xff] }
 0xb11   : > { %1850 = vmatpush.msra.mxu0 %v1673_v13  ;;  %1987 = vmatpush.msrb.mxu3 %v1944_v57 }
 0xb12   : > { %1869 = vmatpush.msra.mxu1 %v1669_v3  ;;  %1968 = vmatpush.msrb.mxu2 %v1941_v58  ;;  %v1931_v3 = vld [vmem:[#allocation5 + $0x140] sm:$0xff] }
 0xb13   : > { %1851 = vmatpush.msra.mxu0 %v1672_v38 }
 0xb14   : > { %1870 = vmatpush.msra.mxu1 %v1668_v4  ;;  %v1932_v4 = vld [vmem:[#allocation5 + $0x148] sm:$0xff] }
 0xb15   : > { %1852 = vmatpush.msra.mxu0 %v1671_v17 }
 0xb16   : > { %1871 = vmatpush.msra.mxu1 %v1667_v5  ;;  %v1929_v5 = vld [vmem:[#allocation5 + $0x130] sm:$0xff] }
 0xb17   : > { %1853 = vmatpush.msra.mxu0 %v1670_v23  ;;  %v2105_v23 = vld [vmem:[#allocation7 + $0x170] sm:$0xff] }
 0xb18   : > { %1872 = vmatpush.msra.mxu1 %v1666_v6  ;;  %v1930_v6 = vld [vmem:[#allocation5 + $0x138] sm:$0xff] }
 0xb1a   : > { %1873 = vmatpush.msra.mxu1 %v1665_v7  ;;  %v1927_v7 = vld [vmem:[#allocation5 + $0x120] sm:$0xff] }
 0xb1c   : > { %1874 = vmatpush.msra.mxu1 %v1664_v8  ;;  %v1928_v8 = vld [vmem:[#allocation5 + $0x128] sm:$0xff] }
 0xb1e   : > { %1875 = vmatpush.msra.mxu1 %v1663_v9  ;;  %v1925_v9 = vld [vmem:[#allocation5 + $0x110] sm:$0xff] }
 0xb20   : > { %1876 = vmatpush.msra.mxu1 %v1662_v11  ;;  %v1926_v11 = vld [vmem:[#allocation5 + $0x118] sm:$0xff] }
 0xb85   : > { %v1752_v59 = vpop.f32.mrf.mxu0 }
 0xb8d   : > { %v1780_v61 = vpop.f32.mrf.mxu0 }
 0xb8e   : > { %v1783_v62 = vmul.f32 0.125, %v1780_v61  ;;  %v1939_v61 = vld [vmem:[#allocation5 + $0x180] sm:$0xff] }
 0xb8f   : > { %1969 = vmatpush.msrb.mxu2 %v1939_v61  ;;  %v2114_v61 = vld [vmem:[#allocation7 + $0x1b8] sm:$0xff] }
 0xb90   : > { %v1784_v63 = vsel %vm1049_vm7, %v1783_v62, -inf }
 0xb91   : > { %1785 = vmax.xlane.f32.xlu2 %v1784_v63  ;;  %v1937_v63 = vld [vmem:[#allocation5 + $0x170] sm:$0xff] }
 0xb92   : > { %1970 = vmatpush.msrb.mxu2 %v1937_v63 }
 0xc04   : > { %v1786_v0 = vpop.xlane.xlu2 %1785 }
 0xc05   : > { %v1787_v1 = vsub.f32 %v1783_v62, %v1786_v0  ;;  %v1940_v62 = vld [vmem:[#allocation5 + $0x188] sm:$0xff]  ;;  %v1938_v0 = vld [vmem:[#allocation5 + $0x178] sm:$0xff] }
 0xc07   : > { %v1788_v2 = vmul.f32 1.442695, %v1787_v1  ;;  %v1935_v1 = vld [vmem:[#allocation5 + $0x160] sm:$0xff] }
 0xc08   : > { %1971 = vmatpush.msrb.mxu2 %v1935_v1 }
 0xc09   : > { %2493 = vpow2.f32 %v1788_v2  ;;  %v1936_v2 = vld [vmem:[#allocation5 + $0x168] sm:$0xff] }
 0xc0f   : > { %v2494_v53 = vpop.eup %2493 }
 0xc10   : > { %v1790_v30 = vsel %vm1049_vm7, %v2494_v53, 0.0 }
 0xc11   : > { %1791 = vadd.xlane.f32.xlu1 %v1790_v30  ;;  %v1934_v30 = vld [vmem:[#allocation5 + $0x158] sm:$0xff] }
 0xc84   : > { %v1792_v15 = vpop.xlane.xlu1 %1791 }
 0xc85   : > { %2495 = vrcp.f32 %v1792_v15  ;;  %v1804_v20 = vand.u32 2147483648, %v1792_v15  ;;  %v1802_v22 = vand.u32 2147483647, %v1792_v15  ;;  %vm1798_vm10 = vweird.f32 %v1792_v15 }
 0xc87   : > { %v1805_v26 = vor.u32 1.1754944e-38, %v1804_v20  ;;  %vm1803_vm13 = vcmp.eq.f32.partialorder %v1802_v22, 8.507059e+37  ;;  %v2466_v20 = vld [vmem:[%s3728_s11 + $0x1] ss:$0 sm:$0xff] }
 0xc8b   : > { %v2496_v18 = vpop.eup %2495 }
 0xc8c   : > { %v1794_v25 = vmul.f32 %v2496_v18, %v1792_v15  ;;  %vm1799_vm7 = vweird.f32 %v2496_v18 }
 0xc8d   : > { %vm1800_vm11 = vmor %vm1798_vm10, %vm1799_vm7 }
 0xc8e   : > { %v1795_v19 = vsub.f32 1.0, %v1794_v25 }
 0xc90   : > { %v1796_v21 = vmul.f32 %v2496_v18, %v1795_v19 }
 0xc92   : > { %v1797_v24 = vadd.f32 %v2496_v18, %v1796_v21 }
 0xc94   : > { %v1801_v28 = vsel %vm1800_vm11, %v2496_v18, %v1797_v24 }
 0xc95   : > { %v1806_v29 = vsel %vm1803_vm13, %v1805_v26, %v1801_v28  ;;  %v2106_v28 = vld [vmem:[#allocation7 + $0x178] sm:$0xff] }
 0xc96   : > { %v1807_v31 = vmul.f32 %v2494_v53, %v1806_v29  ;;  %v1933_v53 = vld [vmem:[#allocation5 + $0x150] sm:$0xff]  ;;  %v2122_v29 = vld [vmem:[#allocation7 + $0x1f8] sm:$0xff]  ;;  %2123 = vmatpush.msrb.mxu0 %v2106_v28  ;;  %v2108_v28 = vld [vmem:[#allocation7 + $0x188] sm:$0xff] }
 0xc97   : > { %1972 = vmatpush.msrb.mxu2 %v1933_v53  ;;  %v2113_v53 = vld [vmem:[#allocation7 + $0x1b0] sm:$0xff] }
 0xc98   : > { %2366 = vmatmul.msk.f32.vlgmr.msrb.gmra.mxu1 %vm1074_vm12, %v1807_v31  ;;  %v2372_v31 = vld [vmem:[%s3731_s14 + $0x2] sm:$0x3]  ;;  %2124 = vmatpush.msrb.mxu0 %v2105_v23  ;;  %v2091_v23 = vld [vmem:[#allocation7 + $0x100] sm:$0xff] }
 0xc99   : > { %1973 = vmatpush.msrb.mxu2 %v1931_v3  ;;  %2143 = vmatpush.msrb.mxu1 %v2122_v29 }
 0xc9b   : > { %1974 = vmatpush.msrb.mxu2 %v1929_v5 }
 0xc9d   : > { %1975 = vmatpush.msrb.mxu2 %v1927_v7  ;;  %v2112_v7 = vld [vmem:[#allocation7 + $0x1a8] sm:$0xff] }
 0xc9f   : > { %1976 = vmatpush.msrb.mxu2 %v1925_v9 }
 0xca0   : > { %2368 = vmatmul.msk.f32.vlgmr.msra.gmra.mxu1 %vm1021_vm6, %v1752_v59  ;;  %v1942_v59 = vld [vmem:[#allocation5 + $0x198] sm:$0xff] }
 0xca1   : > { %1988 = vmatpush.msrb.mxu3 %v1942_v59  ;;  %1977 = vmatpush.msrb.mxu2 %v1923_v12  ;;  %v2098_v59 = vld [vmem:[#allocation7 + $0x138] sm:$0xff] }
 0xca3   : > { %1989 = vmatpush.msrb.mxu3 %v1940_v62 }
 0xca5   : > { %1990 = vmatpush.msrb.mxu3 %v1938_v0 }
 0xca7   : > { %1991 = vmatpush.msrb.mxu3 %v1936_v2  ;;  %v2097_v2 = vld [vmem:[#allocation7 + $0x130] sm:$0xff] }
 0xca9   : > { %1992 = vmatpush.msrb.mxu3 %v1934_v30 }
 0xcab   : > { %1993 = vmatpush.msrb.mxu3 %v1932_v4 }
 0xcad   : > { %1994 = vmatpush.msrb.mxu3 %v1930_v6  ;;  %v2096_v6 = vld [vmem:[#allocation7 + $0x128] sm:$0xff] }
 0xcaf   : > { %1995 = vmatpush.msrb.mxu3 %v1928_v8 }
 0xcb1   : > { %1996 = vmatpush.msrb.mxu3 %v1926_v11 }
 0xcb3   : > { %1997 = vmatpush.msrb.mxu3 %v1924_v14  ;;  %v2095_v14 = vld [vmem:[#allocation7 + $0x120] sm:$0xff] }
 0xd15   : > { %v1832_v32 = vpop.f32.mrf.mxu1 }
 0xd16   : > { %2367 = vmatmul.msk.f32.vlgmr.msra.gmra.mxu0 %vm1021_vm6, %v1832_v32  ;;  %v2121_v32 = vld [vmem:[#allocation7 + $0x1f0] sm:$0xff] }
 0xd17   : > { %2144 = vmatpush.msrb.mxu1 %v2121_v32  ;;  %v2107_v32 = vld [vmem:[#allocation7 + $0x180] sm:$0xff] }
 0xd1d   : > { %v1878_v60 = vpop.f32.mrf.mxu1 }
 0xd93   : > { %v1855_v34 = vpop.f32.mrf.mxu0 }
 0xd94   : > { %v1879_v35 = vadd.f32 %v1878_v60, %v1855_v34  ;;  %v2120_v60 = vld [vmem:[#allocation7 + $0x1e8] sm:$0xff]  ;;  %v1958_v34 = vperm.slane %v2372_v31, 0 }
 0xd95   : > { %2145 = vmatpush.msrb.mxu1 %v2120_v60 }
 0xd96   : > { %v1886_v36 = vadd.f32 %v2465_v33, %v1879_v35  ;;  %v2104_v33 = vld [vmem:[#allocation7 + $0x168] sm:$0xff]  ;;  %v1959_v35 = vperm.slane %v2372_v31, 1 }
 0xd97   : > { %2125 = vmatpush.msrb.mxu0 %v2104_v33 }
 0xd98   : > { %v3616_v39 = vadd.f32 %v1886_v36, %v3429_v16  ;;  %v2103_v36 = vld [vmem:[#allocation7 + $0x160] sm:$0xff] }
 0xd99   : > { %2126 = vmatpush.msrb.mxu0 %v2103_v36 }
 0xd9a   : > { %v1892_v40 = vsel %vm851_vm1, %v3616_v39, 0.0 }
 0xd9b   : > { %1893 = vadd.xlane.f32.xlu2 %v1892_v40  ;;  %v2119_v40 = vld [vmem:[#allocation7 + $0x1e0] sm:$0xff]  ;;  %2127 = vmatpush.msrb.mxu0 %v2102_v44 }
 0xd9c   : > { %2146 = vmatpush.msrb.mxu1 %v2119_v40 }
 0xd9e   : > { %2147 = vmatpush.msrb.mxu1 %v2118_v45 }
 0xe0e   : > { %v1894_v46 = vpop.xlane.xlu2 %1893 }
 0xe0f   : > { %v1895_v47 = vmul.f32 %v1894_v46, %v3190_v10 }
 0xe11   : > { %v3622_v48 = vsub.f32 %v3616_v39, %v1895_v47 }
 0xe13   : > { %v1897_v16 = vmul.f32 %v3622_v48, %v3622_v48 }
 0xe15   : > { %v1898_v49 = vsel %vm851_vm1, %v1897_v16, 0.0  ;;  %v2117_v16 = vld [vmem:[#allocation7 + $0x1d0] sm:$0xff] }
 0xe16   : > { %1899 = vadd.xlane.f32.xlu0 %v1898_v49  ;;  %2148 = vmatpush.msrb.mxu1 %v2117_v16 }
 0xe18   : > { %2149 = vmatpush.msrb.mxu1 %v2116_v52 }
 0xe1a   : > { %2150 = vmatpush.msrb.mxu1 %v2115_v56 }
 0xe1c   : > { %2151 = vmatpush.msrb.mxu1 %v2114_v61 }
 0xe1e   : > { %2152 = vmatpush.msrb.mxu1 %v2113_v53 }
 0xe20   : > { %2153 = vmatpush.msrb.mxu1 %v2112_v7 }
 0xe89   : > { %v1900_v27 = vpop.xlane.xlu0 %1899 }
 0xe8a   : > { %v1901_v15 = vmul.f32 %v1900_v27, %v3190_v10  ;;  %v2467_v10 = vld [vmem:[%s3729_s12 + $0x1] ss:$0 sm:$0xff]  ;;  %v2111_v27 = vld [vmem:[#allocation7 + $0x1a0] sm:$0xff] }
 0xe8b   : > { %2154 = vmatpush.msrb.mxu1 %v2111_v27 }
 0xe8c   : > { %v1902_v43 = vadd.f32 1e-12, %v1901_v15 }
 0xe8e   : > { %2497 = vrsqrt.f32 %v1902_v43  ;;  %vm1909_vm12 = vweird.f32 %v1902_v43 }
 0xe94   : > { %v2498_v13 = vpop.eup %2497 }
 0xe95   : > { %v1904_v38 = vmul.f32 %v2498_v13, %v1902_v43  ;;  %vm1910_vm6 = vweird.f32 %v2498_v13 }
 0xe96   : > { %vm1911_vm14 = vmor %vm1909_vm12, %vm1910_vm6 }
 0xe97   : > { %v1905_v17 = vmul.f32 %v2498_v13, %v1904_v38  ;;  %v2094_v38 = vld [vmem:[#allocation7 + $0x118] sm:$0xff] }
 0xe99   : > { %v1906_v18 = vmul.f32 0.5, %v1905_v17  ;;  %v2110_v17 = vld [vmem:[#allocation7 + $0x198] sm:$0xff] }
 0xe9a   : > { %2155 = vmatpush.msrb.mxu1 %v2110_v17 }
 0xe9b   : > { %v1907_v25 = vsub.f32 1.5, %v1906_v18 }
 0xe9d   : > { %v1908_v19 = vmul.f32 %v2498_v13, %v1907_v25 }
 0xe9f   : > { %v1912_v21 = vsel %vm1911_vm14, %v2498_v13, %v1908_v19 }
 0xea0   : > { %v1913_v22 = vmul.f32 %v1912_v21, %v3622_v48  ;;  %v2101_v48 = vld [vmem:[#allocation7 + $0x150] sm:$0xff] }
 0xea1   : > { %2128 = vmatpush.msrb.mxu0 %v2101_v48  ;;  %v2109_v21 = vld [vmem:[#allocation7 + $0x190] sm:$0xff] }
 0xea2   : > { %v1917_v24 = vmul.f32 %v2466_v20, %v1913_v22  ;;  %v2093_v20 = vld [vmem:[#allocation7 + $0x110] sm:$0xff]  ;;  %2156 = vmatpush.msrb.mxu1 %v2109_v21 }
 0xea3   : > { %2129 = vmatpush.msrb.mxu0 %v2100_v51 }
 0xea4   : > { %v1921_v26 = vadd.f32 %v2467_v10, %v1917_v24  ;;  %2157 = vmatpush.msrb.mxu1 %v2108_v28 }
 0xea5   : > { %2130 = vmatpush.msrb.mxu0 %v2099_v55 }
 0xea6   : > { %1978 = vmatmul.f32.vlgmr.msrb.gmra.mxu2 %v1921_v26  ;;  %1998 = vmatmul.f32.vlgmr.msrb.gmra.mxu3 %v1921_v26  ;;  %v2092_v26 = vld [vmem:[#allocation7 + $0x108] sm:$0xff] }
 0xea7   : > { %2131 = vmatpush.msrb.mxu0 %v2098_v59  ;;  %2158 = vmatpush.msrb.mxu1 %v2107_v32 }
 0xea9   : > { %2132 = vmatpush.msrb.mxu0 %v2097_v2 }
 0xeab   : > { %2133 = vmatpush.msrb.mxu0 %v2096_v6 }
 0xead   : > { %2134 = vmatpush.msrb.mxu0 %v2095_v14 }
 0xeaf   : > { %2135 = vmatpush.msrb.mxu0 %v2094_v38 }
 0xeb1   : > { %2136 = vmatpush.msrb.mxu0 %v2093_v20  ;;  %v2676_v20 = vmov 5.0  }
 0xeb3   : > { %2137 = vmatpush.msrb.mxu0 %v2092_v26 }
 0xeb5   : > { %2138 = vmatpush.msrb.mxu0 %v2091_v23 }
 0xf29   : > { %v1979_v41 = vpop.f32.mrf.mxu2  ;;  %v1999_v42 = vpop.f32.mrf.mxu3 }
 0xf2a   : > { %v3638_v46 = vadd.f32 %v1979_v41, %v1958_v34  ;;  %v3640_v47 = vadd.f32 %v1999_v42, %v1959_v35 }
 0xf2c   : > { %v3643_v49 = vmul.f32 0.70710677, %v3638_v46  ;;  %v3646_v50 = vmul.f32 0.70710677, %v3640_v47  ;;  %v2002_v38 = vmul.f32 0.5, %v3638_v46 }
 0xf2d   : > { %v2468_v46 = vld [vmem:[%s3733_s16 + $0x1] ss:$0 sm:$0xff] }
 0xf2e   : > { %v2006_v54 = vmul.f32 %v3643_v49, %v3643_v49  ;;  %v2046_v37 = vmul.f32 %v3646_v50, %v3646_v50 }
 0xf30   : > { %v3652_v57 = vmin.f32 %v2006_v54, 16.0  ;;  %v3654_v58 = vmin.f32 %v2046_v37, 16.0 }
 0xf32   : > { %v2008_v62 = vmul.f32 2.1237322e-06, %v3652_v57  ;;  %v2019_v63 = vmul.f32 3.8918573e-05, %v3652_v57  ;;  %v2048_v0 = vmul.f32 2.1237322e-06, %v3654_v58 }
 0xf33   : > { %v2059_v1 = vmul.f32 3.8918573e-05, %v3654_v58 }
 0xf34   : > { %v2009_v30 = vadd.f32 0.00028619796, %v2008_v62  ;;  %v2020_v3 = vadd.f32 0.001143296, %v2019_v63  ;;  %v2049_v4 = vadd.f32 0.00028619796, %v2048_v0 }
 0xf35   : > { %v2060_v5 = vadd.f32 0.001143296, %v2059_v1 }
 0xf36   : > { %v2010_v8 = vmul.f32 %v2009_v30, %v3652_v57  ;;  %v2021_v9 = vmul.f32 %v2020_v3, %v3652_v57  ;;  %v2050_v11 = vmul.f32 %v2049_v4, %v3654_v58 }
 0xf37   : > { %v2061_v12 = vmul.f32 %v2060_v5, %v3654_v58 }
 0xf38   : > { %v2011_v15 = vadd.f32 0.0036580483, %v2010_v8  ;;  %v2022_v43 = vadd.f32 0.014752088, %v2021_v9  ;;  %v2051_v25 = vadd.f32 0.0036580483, %v2050_v11 }
 0xf39   : > { %v2062_v13 = vadd.f32 0.014752088, %v2061_v12 }
 0xf3a   : > { %v2023_v18 = vmul.f32 %v2022_v43, %v3652_v57  ;;  %v2012_v22 = vmul.f32 %v2011_v15, %v3652_v57  ;;  %v2052_v31 = vmul.f32 %v2051_v25, %v3654_v58 }
 0xf3b   : > { %v2063_v19 = vmul.f32 %v2062_v13, %v3654_v58 }
 0xf3c   : > { %v2024_v10 = vadd.f32 0.112945676, %v2023_v18  ;;  %v2013_v60 = vadd.f32 0.05243302, %v2012_v22  ;;  %v2053_v40 = vadd.f32 0.05243302, %v2052_v31 }
 0xf3d   : > { %v2064_v24 = vadd.f32 0.112945676, %v2063_v19  ;;  %v2003_v18 = vmul.f32 0.5, %v3640_v47 }
 0xf3e   : > { %v2025_v29 = vmul.f32 %v2024_v10, %v3652_v57  ;;  %v2014_v42 = vmul.f32 %v2013_v60, %v3652_v57  ;;  %v2054_v48 = vmul.f32 %v2053_v40, %v3654_v58 }
 0xf3f   : > { %v2065_v33 = vmul.f32 %v2064_v24, %v3654_v58 }
 0xf40   : > { %v2026_v34 = vadd.f32 0.4994258, %v2025_v29  ;;  %v2015_v16 = vadd.f32 0.18741608, %v2014_v42  ;;  %v2055_v51 = vadd.f32 0.18741608, %v2054_v48 }
 0xf41   : > { %v2066_v35 = vadd.f32 0.4994258, %v2065_v33 }
 0xf42   : > { %v2027_v36 = vmul.f32 %v2026_v34, %v3652_v57  ;;  %v2016_v54 = vmul.f32 %v2015_v16, %v3652_v57  ;;  %v2056_v56 = vmul.f32 %v2055_v51, %v3654_v58 }
 0xf43   : > { %v2067_v41 = vmul.f32 %v2066_v35, %v3654_v58 }
 0xf44   : > { %v2028_v44 = vadd.f32 1.0, %v2027_v36  ;;  %v2017_v62 = vadd.f32 1.1283791, %v2016_v54  ;;  %v2057_v30 = vadd.f32 1.1283791, %v2056_v56 }
 0xf45   : > { %v2068_v45 = vadd.f32 1.0, %v2067_v41 }
 0xf46   : > { %2499 = vrcp.f32 %v2028_v44  ;;  %v2040_v63 = vand.u32 2147483648, %v2028_v44  ;;  %v2038_v2 = vand.u32 2147483647, %v2028_v44  ;;  %vm2034_vm2 = vweird.f32 %v2028_v44 }
 0xf47   : > { %2501 = vrcp.f32 %v2068_v45  ;;  %v2080_v53 = vand.u32 2147483648, %v2068_v45  ;;  %v2078_v4 = vand.u32 2147483647, %v2068_v45  ;;  %vm2074_vm4 = vweird.f32 %v2068_v45 }
 0xf48   : > { %v2041_v57 = vor.u32 1.1754944e-38, %v2040_v63  ;;  %v2018_v58 = vmul.f32 %v2017_v62, %v3643_v49  ;;  %vm2039_vm5 = vcmp.eq.f32.partialorder %v2038_v2, 8.507059e+37  ;;  %v2058_v11 = vmul.f32 %v2057_v30, %v3646_v50 }
 0xf49   : > { %v2081_v8 = vor.u32 1.1754944e-38, %v2080_v53  ;;  %vm2079_vm9 = vcmp.eq.f32.partialorder %v2078_v4, 8.507059e+37  ;;  %2503 = vrcp.f32 %v2676_v20 }
 0xf4c   : > { %v2500_v52 = vpop.eup %2499 }
 0xf4d   : > { %v2502_v37 = vpop.eup %2501  ;;  %v2030_v55 = vmul.f32 %v2500_v52, %v2028_v44  ;;  %vm2035_vm15 = vweird.f32 %v2500_v52 }
 0xf4e   : > { %v2070_v59 = vmul.f32 %v2502_v37, %v2068_v45  ;;  %vm2075_vm0 = vweird.f32 %v2502_v37  ;;  %vm2036_vm3 = vmor %vm2034_vm2, %vm2035_vm15 }
 0xf4f   : > { %v2031_v61 = vsub.f32 1.0, %v2030_v55  ;;  %vm2076_vm8 = vmor %vm2074_vm4, %vm2075_vm0  ;;  %v2504_v50 = vpop.eup %2503 }
 0xf50   : > { %v2071_v0 = vsub.f32 1.0, %v2070_v59  ;;  %v2178_v24 = vmul.f32 5.0, %v2504_v50  ;;  %vm2182_vm7 = vweird.f32 %v2504_v50 }
 0xf51   : > { %v2032_v1 = vmul.f32 %v2500_v52, %v2031_v61 }
 0xf52   : > { %v2072_v3 = vmul.f32 %v2502_v37, %v2071_v0  ;;  %v2179_v28 = vsub.f32 1.0, %v2178_v24 }
 0xf53   : > { %v2033_v5 = vadd.f32 %v2500_v52, %v2032_v1 }
 0xf54   : > { %v2073_v6 = vadd.f32 %v2502_v37, %v2072_v3  ;;  %v2180_v23 = vmul.f32 %v2504_v50, %v2179_v28 }
 0xf55   : > { %v2037_v7 = vsel %vm2036_vm3, %v2500_v52, %v2033_v5 }
 0xf56   : > { %v2042_v9 = vsel %vm2039_vm5, %v2041_v57, %v2037_v7  ;;  %v2077_v12 = vsel %vm2076_vm8, %v2502_v37, %v2073_v6  ;;  %v2181_v60 = vadd.f32 %v2504_v50, %v2180_v23 }
 0xf57   : > { %v2043_v14 = vmul.f32 %v2042_v9, %v2018_v58  ;;  %v2082_v27 = vsel %vm2079_vm9, %v2081_v8, %v2077_v12 }
 0xf58   : > { %v2083_v15 = vmul.f32 %v2082_v27, %v2058_v11  ;;  %v2183_v36 = vsel %vm2182_vm7, %v2504_v50, %v2181_v60 }
 0xf59   : > { %v2373_v43 = vclamps-f32 %v2043_v14, 1.0 }
 0xf5a   : > { %v2374_v13 = vclamps-f32 %v2083_v15, 1.0 }
 0xf5b   : > { %v2086_v17 = vadd.f32 1.0, %v2373_v43 }
 0xf5c   : > { %v2087_v49 = vadd.f32 1.0, %v2374_v13 }
 0xf5d   : > { %v2088_v25 = vmul.f32 %v2086_v17, %v2002_v38 }
 0xf5e   : > { %v2089_v19 = vmul.f32 %v2087_v49, %v2003_v18 }
 0xf5f   : > { %2139 = vmatmul.f32.vlgmr.msrb.gmra.mxu0 %v2088_v25 }
 0xf60   : > { %2159 = vmatmul.f32.vlgmr.msrb.gmra.mxu1 %v2089_v19 }
 0xfdc   : > { %v2140_v21 = vpop.f32.mrf.mxu0 }
 0xfdd   : > { %v2160_v22 = vpop.f32.mrf.mxu1 }
 0xfde   : > { %v2161_v10 = vadd.f32 %v2160_v22, %v2140_v21 }
 0xfe0   : > { %v2163_v47 = vadd.f32 %v2161_v10, %v3616_v39 }
 0xfe2   : > { %v2169_v26 = vadd.f32 %v2468_v46, %v2163_v47 }
 0xfe4   : > { %v2170_v29 = vsel %vm851_vm1, %v2169_v26, 0.0 }
 0xfe5   : > { %v2171_v31 = vrot.slane %v2170_v29, 4 }
 0xfe7   : > { %v2172_v32 = vadd.f32 %v2171_v31, %v2170_v29 }
 0xfe9   : > { %v2173_v33 = vrot.slane %v2172_v32, 2 }
 0xfeb   : > { %v2174_v34 = vadd.f32 %v2173_v33, %v2172_v32 }
 0xfed   : > { %v2175_v35 = vrot.slane %v2174_v34, 1 }
 0xfef   : > { %v2176_v39 = vadd.f32 %v2175_v35, %v2174_v34 }
 0xff1   : > { %v2184_v40 = vmul.f32 %v2183_v36, %v2176_v39 }
 0xff3   : > { %2185 = vst [vmem:[%s590_s13] sm:$0x1] %v2184_v40 }
 0xff4   : > { %2622 = shalt.err (!%p2619_p8)
}
 0xff5   : > { %2391 = dma.vmem_to_hbm [thread:$0]  (%p2805_p5), %s2198_s26, 16, %s2200_s0, %s2187_s17  }
 0xff6 PF: > { %s3767_s18 = sld [smem:[#allocation14_spill]] }
 0xff7   : > { %s3768_s29 = sld [smem:[#allocation12_spill]] }
 0xffc   : > { %p2413_p9 = scmp.ge.s32.totalorder %s3767_s18, 2 }
 0xffd   : > { %s2211_s13 = sand.u32 1, %s3768_s29  }
 0xffe   : > { %p2404_p10 = pnand %p2413_p9, %p2809_p6  ;;  %s2212_s28 = scalar_lea.sflag [#allocation4], %s2211_s13 }
0x1000   : > { %p2405_p11 = pneg %p2404_p10 }
0x1002   : > { %2648 = dma.done.wait (%p2405_p11), %s2212_s28, 16  }
0x1003   : > { %2650 = vsyncadd (%p2405_p11), %s2212_s28, 4294967280  ;;  %s3770_s27 = sld [smem:[#allocation15_spill]]  ;;  %s3773_s24 = smov %s2657_s25 }
0x1004   : > { %s3771_s9 = sld [smem:[#allocation13_spill]] }
0x1005   : > { %s3772_s26 = sld [smem:[#allocation16_spill]] }
0x1009   : > { %p29_p12 = scmp.ge.s32.totalorder %s3770_s27, 4  }
0x100a   : > { %s3774_s25 = smov %s3771_s9 }
0x100b   :  { %31 = sbr.rel (!%p29_p12) target bundleno = 11 (0xb), region = 150 }
0x1010   :  { %2217 = vsyncpa [#allocation3], 1 }
0x1011   :  { %2219 = vsyncpa [#allocation3 + $0x1], 1 }
0x1012   :  { %2220 = vsyncpa [#allocation6], 1 }
0x1013   :  { %2221 = vsyncpa [#allocation4], 1 }
0x1014   :  { %2223 = vsyncpa [#allocation4 + $0x1], 1 }

</bundles_post_ra>
